<compile_context>
chip_gen: v7x
topology: tpu7x:2x2x1
jax: 0.10.0
libtpu: 0.0.40
codegen_flags: <defaults>
</compile_context>

<pallas_src>
import functools

import jax
import jax.numpy as jnp
from jax.experimental import pallas as pl
from jax.experimental.pallas import tpu as pltpu


def _round_up(x, m):
    return (x + m - 1) // m * m


def _head_kernel(x_ref, w_ref, b_ref, cls_ref, feat_ref, *, inv_hw):
    # x_ref: (TN, C, HW) -- NCHW feature map with H*W flattened (no transpose).
    x = x_ref[...].astype(jnp.float32)

    # Global average pool == mean over the flattened spatial (lane) axis.
    feat = jnp.sum(x, axis=-1) * inv_hw                  # (TN, C)
    feat_ref[...] = feat.astype(feat_ref.dtype)          # x_feature (pre-BN)

    # BatchNorm1d is folded into (w_ref, b_ref) by the wrapper.
    # Dropout(p=0.0) is the identity.
    cls = jnp.dot(feat, w_ref[...], preferred_element_type=jnp.float32)
    cls_ref[...] = (cls + b_ref[...]).astype(cls_ref.dtype)


def transfernet_head(x_nchw, gamma, beta, running_mean, running_var,
                     cls_w, cls_b, *, tn=16, eps=1e-5):
    """x_nchw: (N, C, H, W) -- output of self.base(x, 'task') (f32 or bf16).
    Returns (x_class, x_feature) matching the PyTorch forward (eval mode)."""
    N, C, H, W = x_nchw.shape
    HW = H * W
    num_classes = cls_w.shape[0]

    # ---- fold inference BatchNorm1d into the classifier (wrapper-side) ----
    # xbn = (feat - mean) * scale + beta,  scale = gamma / sqrt(var + eps)
    # cls = xbn @ W^T + b = feat @ (W^T * scale[:,None]) + (b + (beta - mean*scale) @ W^T)
    scale = gamma.astype(jnp.float32) * jax.lax.rsqrt(
        running_var.astype(jnp.float32) + eps)                       # (C,)
    w_cn = cls_w.T.astype(jnp.float32)                               # (C, nc)
    w_fold = w_cn * scale[:, None]                                   # (C, nc)
    b_fold = cls_b.astype(jnp.float32) + (
        (beta.astype(jnp.float32) - running_mean.astype(jnp.float32) * scale)
        @ w_cn)                                                      # (nc,)

    # Lane-dense logits: pad classes up to a multiple of 128.
    ncp = _round_up(max(num_classes, 1), 128)
    w_pad = jnp.pad(w_fold, ((0, 0), (0, ncp - num_classes)))        # (C, ncp)
    b_pad = jnp.pad(b_fold, (0, ncp - num_classes)).reshape(1, ncp)  # (1, ncp)

    # Batch tiling: TN must be a multiple of 8; pad N up to a multiple of TN.
    tn_eff = min(_round_up(tn, 8), _round_up(N, 8))
    n_pad = _round_up(N, tn_eff)

    # NCHW -> (N, C, H*W) is a free reshape (contiguous; no HBM rewrite).
    x_flat = x_nchw.reshape(N, C, HW)
    if n_pad != N:
        x_flat = jnp.pad(x_flat, ((0, n_pad - N), (0, 0), (0, 0)))

    grid = (n_pad // tn_eff,)
    kernel = functools.partial(_head_kernel, inv_hw=1.0 / HW)

    elt = jnp.dtype(x_flat.dtype).itemsize
    cost = pl.CostEstimate(
        flops=2 * n_pad * C * ncp,
        transcendentals=0,
        bytes_accessed=(n_pad * C * HW * elt          # activations in
                        + (C * ncp + ncp) * 4         # folded weights / bias
                        + n_pad * (C + ncp) * 4),     # feat + logits out
    )

    cls_out, feat_out = pl.pallas_call(
        kernel,
        out_shape=(
            jax.ShapeDtypeStruct((n_pad, ncp), jnp.float32),   # x_class (padded)
            jax.ShapeDtypeStruct((n_pad, C), jnp.float32),     # x_feature
        ),
        grid=grid,
        in_specs=[
            # batch-tiled activations; (C, HW) are full dims so any C/HW is legal
            pl.BlockSpec((tn_eff, C, HW), lambda i: (i, 0, 0)),
            # folded classifier weight / bias: constant index_map -> stays resident
            pl.BlockSpec((C, ncp), lambda i: (0, 0)),
            pl.BlockSpec((1, ncp), lambda i: (0, 0)),
        ],
        out_specs=(
            pl.BlockSpec((tn_eff, ncp), lambda i: (i, 0)),
            pl.BlockSpec((tn_eff, C), lambda i: (i, 0)),
        ),
        compiler_params=pltpu.CompilerParams(
            # batch axis is embarrassingly parallel -> 2 TCs on v7x
            dimension_semantics=("parallel",),
            # raise v5e's 16 MiB scoped default; safe on v6e/v7x as well
            vmem_limit_bytes=32 * 1024 * 1024,
        ),
        cost_estimate=cost,
    )(x_flat, w_pad, b_pad)

    return cls_out[:N, :num_classes], feat_out[:N]


if __name__ == "__main__":
    # Small, TPU-friendly shapes standing in for the real ones
    # (real: out_planes=1280, spatial 7x7 from MobileNetV2; here C=128, 4x4).
    N, C, H, W = 2, 128, 4, 4
    num_classes = 16

    key = jax.random.PRNGKey(0)
    kx, kw, kb, km, kv = jax.random.split(key, 5)

    # Base feature map (stand-in for self.base(x, 'task') output), NCHW.
    x = jax.random.normal(kx, (N, C, H, W), dtype=jnp.float32)

    # BatchNorm1d params: init.constant_(weight, 1), init.constant_(bias, 0);
    # non-trivial running stats (as in a trained model) to exercise the fold.
    gamma = jnp.ones((C,), jnp.float32)
    beta = jnp.zeros((C,), jnp.float32)
    running_mean = 0.1 * jax.random.normal(km, (C,), jnp.float32)
    running_var = jax.random.uniform(kv, (C,), jnp.float32, minval=0.5, maxval=1.5)

    # Classifier Linear(C, num_classes): deterministic synthetic weights.
    bound = 1.0 / (C ** 0.5)
    cls_w = jax.random.uniform(kw, (num_classes, C), jnp.float32, -bound, bound)
    cls_b = jax.random.uniform(kb, (num_classes,), jnp.float32, -bound, bound)

    x_class, x_feature = transfernet_head(
        x, gamma, beta, running_mean, running_var, cls_w, cls_b)
    jax.block_until_ready((x_class, x_feature))

    # Reference check against plain JAX (same semantics as the PyTorch head).
    feat_ref = jnp.mean(x, axis=(2, 3))                                   # (N, C)
    xbn_ref = (feat_ref - running_mean) / jnp.sqrt(running_var + 1e-5) * gamma + beta
    cls_ref = xbn_ref @ cls_w.T + cls_b
    assert x_class.shape == (N, num_classes) and x_feature.shape == (N, C)
    assert jnp.allclose(x_feature, feat_ref, atol=1e-5), "feature mismatch"
    assert jnp.allclose(x_class, cls_ref, atol=1e-4), "class logits mismatch"

    print("KERNEL_OK")
</pallas_src>

<mosaic_0001>
module attributes {stable_mosaic.version = 11 : i64} {
  func.func @_head_kernel(%arg0: i32, %arg1: memref<8x128x16xf32, #tpu.memory_space<vmem>>, %arg2: memref<128x128xf32, #tpu.memory_space<vmem>>, %arg3: memref<1x128xf32, #tpu.memory_space<vmem>>, %arg4: memref<8x128xf32, #tpu.memory_space<vmem>>, %arg5: memref<8x128xf32, #tpu.memory_space<vmem>>) attributes {dimension_semantics = [#tpu.dimension_semantics<parallel>], iteration_bounds = array<i64: 1>, scalar_prefetch = 0 : i64, scratch_operands = 0 : i64, tpu.core_type = #tpu.core_type<tc>, window_params = [{transform_indices = @transform_0, window_bounds = array<i64: 8, 128, 16>}, {pipeline_mode = #tpu.pipeline_mode<synchronous>, transform_indices = @transform_1, window_bounds = array<i64: 128, 128>}, {pipeline_mode = #tpu.pipeline_mode<synchronous>, transform_indices = @transform_2, window_bounds = array<i64: 1, 128>}, {transform_indices = @transform_3, window_bounds = array<i64: 8, 128>}, {transform_indices = @transform_4, window_bounds = array<i64: 8, 128>}]} {
    %c0 = arith.constant 0 : index
    %c0_0 = arith.constant 0 : index
    %c0_1 = arith.constant 0 : index
    %0 = vector.load %arg1[%c0, %c0_0, %c0_1] : memref<8x128x16xf32, #tpu.memory_space<vmem>>, vector<8x128x16xf32>
    %cst = arith.constant dense<0.000000e+00> : vector<8x128xf32>
    %1 = vector.multi_reduction <add>, %0, %cst [2] : vector<8x128x16xf32> to vector<8x128xf32>
    %cst_2 = arith.constant 6.250000e-02 : f32
    %2 = vector.broadcast %cst_2 : f32 to vector<8x128xf32>
    %3 = arith.mulf %1, %2 : vector<8x128xf32>
    %c0_3 = arith.constant 0 : index
    %c0_4 = arith.constant 0 : index
    %4 = vector.load %arg5[%c0_3, %c0_4] : memref<8x128xf32, #tpu.memory_space<vmem>>, vector<8x128xf32>
    tpu.vector_store %arg5[%c0_3, %c0_4], %3 {strides = array<i32>} : memref<8x128xf32, #tpu.memory_space<vmem>>, vector<8x128xf32>,
    %c0_5 = arith.constant 0 : index
    %c0_6 = arith.constant 0 : index
    %5 = vector.load %arg2[%c0_5, %c0_6] : memref<128x128xf32, #tpu.memory_space<vmem>>, vector<128x128xf32>
    %cst_7 = arith.constant dense<0.000000e+00> : vector<8x128xf32>
    %6 = tpu.matmul %3, %5, %cst_7 {dimension_numbers = #tpu.dot_dimension_numbers<[1], [0], [0], [1], [0, 0, 1, 1], [], []>} : vector<8x128xf32>, vector<128x128xf32>, vector<8x128xf32> -> vector<8x128xf32>
    %c0_8 = arith.constant 0 : index
    %c0_9 = arith.constant 0 : index
    %7 = vector.load %arg3[%c0_8, %c0_9] : memref<1x128xf32, #tpu.memory_space<vmem>>, vector<1x128xf32>
    %8 = vector.broadcast %7 : vector<1x128xf32> to vector<8x128xf32>
    %9 = arith.addf %6, %8 : vector<8x128xf32>
    %c0_10 = arith.constant 0 : index
    %c0_11 = arith.constant 0 : index
    %10 = vector.load %arg4[%c0_10, %c0_11] : memref<8x128xf32, #tpu.memory_space<vmem>>, vector<8x128xf32>
    tpu.vector_store %arg4[%c0_10, %c0_11], %9 {strides = array<i32>} : memref<8x128xf32, #tpu.memory_space<vmem>>, vector<8x128xf32>,
    return
  }
  func.func @transform_0(%arg0: i32) -> (i32, i32, i32) {
    %c0_i32 = arith.constant 0 : i32
    %c0_i32_0 = arith.constant 0 : i32
    %c0_i32_1 = arith.constant 0 : i32
    return %arg0, %c0_i32, %c0_i32_0 : i32, i32, i32
  }
  func.func @transform_1(%arg0: i32) -> (i32, i32) {
    %c0_i32 = arith.constant 0 : i32
    %c0_i32_0 = arith.constant 0 : i32
    %c0_i32_1 = arith.constant 0 : i32
    return %c0_i32, %c0_i32_0 : i32, i32
  }
  func.func @transform_2(%arg0: i32) -> (i32, i32) {
    %c0_i32 = arith.constant 0 : i32
    %c0_i32_0 = arith.constant 0 : i32
    %c0_i32_1 = arith.constant 0 : i32
    return %c0_i32, %c0_i32_0 : i32, i32
  }
  func.func @transform_3(%arg0: i32) -> (i32, i32) {
    %c0_i32 = arith.constant 0 : i32
    %c0_i32_0 = arith.constant 0 : i32
    return %arg0, %c0_i32 : i32, i32
  }
  func.func @transform_4(%arg0: i32) -> (i32, i32) {
    %c0_i32 = arith.constant 0 : i32
    %c0_i32_0 = arith.constant 0 : i32
    return %arg0, %c0_i32 : i32, i32
  }
}

</mosaic_0001>

<bundles_post_ra>
// kernel: tpu_custom_call.1
= control target key start
LH: loop header
LB: loop body
LE: loop exit
PB: predicated region body
PF: predicated region fallthrough
CT: control target
= control target key end

     0   :  { %10 = vsyncpa [#allocation3], 0  ;;  %vm146_vm0 = vcmask 130048   ;;  %s2734_s0 = inlined_call_operand.vmem [shape: f32[8,128,16], index: 0, kind: input, shape index: {}]   ;;  %s2735_s1 = inlined_call_operand.vmem [shape: f32[128,128], index: 1, kind: input, shape index: {}]   ;;  %s2736_s2 = inlined_call_operand.vmem [shape: f32[1,128], index: 2, kind: input, shape index: {}]   ;;  %s2737_s3 = inlined_call_operand.hbm [shape: f32[8,128], index: 3, kind: output, shape index: {0}]   ;;  %s2738_s4 = inlined_call_operand.hbm [shape: f32[8,128], index: 4, kind: output, shape index: {1}]  }
   0x1   :  { %v34_v0 = vld [vmem:[%s2734_s0 + $0x80] sm:$0xff]  ;;  %v35_v2 = vld [vmem:[%s2734_s0 + $0x88] sm:$0xff]  ;;  %v36_v8 = vld [vmem:[%s2734_s0 + $0x90] sm:$0xff] }
   0x2   :  { %v18_v1 = vld [vmem:[%s2734_s0] sm:$0xff]  ;;  %v195_v3 = vsel %vm146_vm0, %v34_v0, 0.0  ;;  %v19_v5 = vld [vmem:[%s2734_s0 + $0x8] sm:$0xff]  ;;  %v198_v6 = vsel %vm146_vm0, %v35_v2, 0.0  ;;  %v20_v9 = vld [vmem:[%s2734_s0 + $0x10] sm:$0xff]  ;;  %v201_v10 = vsel %vm146_vm0, %v36_v8, 0.0 }
   0x3   :  { %v147_v4 = vsel %vm146_vm0, %v18_v1, 0.0  ;;  %196 = vadd.xlane.f32.xlu1 %v195_v3  ;;  %v150_v7 = vsel %vm146_vm0, %v19_v5, 0.0  ;;  %v153_v11 = vsel %vm146_vm0, %v20_v9, 0.0  ;;  %v51_v12 = vld [vmem:[%s2734_s0 + $0x108] sm:$0xff]  ;;  %v50_v13 = vld [vmem:[%s2734_s0 + $0x100] sm:$0xff]  ;;  %v37_v16 = vld [vmem:[%s2734_s0 + $0x98] sm:$0xff] }
   0x4   :  { %148 = vadd.xlane.f32.xlu0 %v147_v4  ;;  %v246_v14 = vsel %vm146_vm0, %v51_v12, 0.0  ;;  %v243_v15 = vsel %vm146_vm0, %v50_v13, 0.0  ;;  %v21_v17 = vld [vmem:[%s2734_s0 + $0x18] sm:$0xff]  ;;  %v204_v18 = vsel %vm146_vm0, %v37_v16, 0.0  ;;  %v66_v20 = vld [vmem:[%s2734_s0 + $0x180] sm:$0xff]  ;;  %v52_v21 = vld [vmem:[%s2734_s0 + $0x110] sm:$0xff] }
   0x5   :  { %v156_v19 = vsel %vm146_vm0, %v21_v17, 0.0  ;;  %v291_v22 = vsel %vm146_vm0, %v66_v20, 0.0  ;;  %v249_v23 = vsel %vm146_vm0, %v52_v21, 0.0  ;;  %v22_v24 = vld [vmem:[%s2734_s0 + $0x20] sm:$0xff]  ;;  %v67_v25 = vld [vmem:[%s2734_s0 + $0x188] sm:$0xff]  ;;  %v53_v28 = vld [vmem:[%s2734_s0 + $0x118] sm:$0xff] }
   0x6   :  { %v159_v26 = vsel %vm146_vm0, %v22_v24, 0.0  ;;  %v294_v27 = vsel %vm146_vm0, %v67_v25, 0.0  ;;  %v38_v29 = vld [vmem:[%s2734_s0 + $0xa0] sm:$0xff]  ;;  %v252_v30 = vsel %vm146_vm0, %v53_v28, 0.0 }
   0x7   :  { %199 = vadd.xlane.f32.xlu1 %v198_v6  ;;  %v207_v31 = vsel %vm146_vm0, %v38_v29, 0.0 }
   0x8   :  { %151 = vadd.xlane.f32.xlu0 %v150_v7 }
   0xb   :  { %202 = vadd.xlane.f32.xlu1 %v201_v10 }
   0xc   :  { %154 = vadd.xlane.f32.xlu0 %v153_v11 }
   0xf   :  { %247 = vadd.xlane.f32.xlu1 %v246_v14 }
  0x10   :  { %244 = vadd.xlane.f32.xlu0 %v243_v15 }
  0x13   :  { %205 = vadd.xlane.f32.xlu1 %v204_v18 }
  0x14   :  { %157 = vadd.xlane.f32.xlu0 %v156_v19 }
  0x17   :  { %292 = vadd.xlane.f32.xlu1 %v291_v22 }
  0x18   :  { %250 = vadd.xlane.f32.xlu0 %v249_v23 }
  0x1b   :  { %160 = vadd.xlane.f32.xlu1 %v159_v26 }
  0x1c   :  { %295 = vadd.xlane.f32.xlu0 %v294_v27 }
  0x1d   :  { %11 = vsyncpa [#allocation5], 0  ;;  %v82_v32 = vld [vmem:[%s2734_s0 + $0x200] sm:$0xff]  ;;  %v68_v33 = vld [vmem:[%s2734_s0 + $0x190] sm:$0xff]  ;;  %vm798_vm1 = vcmask 130112   ;;  %vm805_vm2 = vcmask 195712  }
  0x1e   :  { %v339_v34 = vsel %vm146_vm0, %v82_v32, 0.0  ;;  %v297_v35 = vsel %vm146_vm0, %v68_v33, 0.0  ;;  %v23_v36 = vld [vmem:[%s2734_s0 + $0x28] sm:$0xff]  ;;  %v54_v40 = vld [vmem:[%s2734_s0 + $0x120] sm:$0xff]  ;;  %v84_v44 = vld [vmem:[%s2734_s0 + $0x210] sm:$0xff]  ;;  %vm812_vm3 = vcmask 261312  }
  0x1f   :  { %253 = vadd.xlane.f32.xlu1 %v252_v30  ;;  %v83_v37 = vld [vmem:[%s2734_s0 + $0x208] sm:$0xff]  ;;  %v162_v38 = vsel %vm146_vm0, %v23_v36, 0.0  ;;  %v255_v42 = vsel %vm146_vm0, %v54_v40, 0.0  ;;  %v69_v45 = vld [vmem:[%s2734_s0 + $0x198] sm:$0xff]  ;;  %v345_v46 = vsel %vm146_vm0, %v84_v44, 0.0  ;;  %v98_v49 = vld [vmem:[%s2734_s0 + $0x280] sm:$0xff] }
  0x20   :  { %208 = vadd.xlane.f32.xlu0 %v207_v31  ;;  %v342_v39 = vsel %vm146_vm0, %v83_v37, 0.0  ;;  %v39_v41 = vld [vmem:[%s2734_s0 + $0xa8] sm:$0xff]  ;;  %v300_v47 = vsel %vm146_vm0, %v69_v45, 0.0  ;;  %v387_v51 = vsel %vm146_vm0, %v98_v49, 0.0  ;;  %v40_v52 = vld [vmem:[%s2734_s0 + $0xb0] sm:$0xff]  ;;  %v70_v56 = vld [vmem:[%s2734_s0 + $0x1a0] sm:$0xff] }
  0x21   :  { %v210_v43 = vsel %vm146_vm0, %v39_v41, 0.0  ;;  %v99_v48 = vld [vmem:[%s2734_s0 + $0x288] sm:$0xff]  ;;  %v24_v53 = vld [vmem:[%s2734_s0 + $0x30] sm:$0xff]  ;;  %v213_v54 = vsel %vm146_vm0, %v40_v52, 0.0  ;;  %v303_v58 = vsel %vm146_vm0, %v70_v56, 0.0  ;;  %v85_v61 = vld [vmem:[%s2734_s0 + $0x218] sm:$0xff] }
  0x22   :  { %v390_v50 = vsel %vm146_vm0, %v99_v48, 0.0  ;;  %v165_v55 = vsel %vm146_vm0, %v24_v53, 0.0  ;;  %v55_v57 = vld [vmem:[%s2734_s0 + $0x128] sm:$0xff]  ;;  %v100_v60 = vld [vmem:[%s2734_s0 + $0x290] sm:$0xff]  ;;  %v348_v63 = vsel %vm146_vm0, %v85_v61, 0.0  ;;  %v114_v1 = vld [vmem:[%s2734_s0 + $0x300] sm:$0xff] }
  0x23   :  { %340 = vadd.xlane.f32.xlu1 %v339_v34  ;;  %v258_v59 = vsel %vm146_vm0, %v55_v57, 0.0  ;;  %v393_v62 = vsel %vm146_vm0, %v100_v60, 0.0  ;;  %v115_v0 = vld [vmem:[%s2734_s0 + $0x308] sm:$0xff]  ;;  %v435_v3 = vsel %vm146_vm0, %v114_v1, 0.0  ;;  %v41_v4 = vld [vmem:[%s2734_s0 + $0xb8] sm:$0xff]  ;;  %v56_v9 = vld [vmem:[%s2734_s0 + $0x130] sm:$0xff] }
  0x24   :  { %298 = vadd.xlane.f32.xlu0 %v297_v35  ;;  %v438_v2 = vsel %vm146_vm0, %v115_v0, 0.0  ;;  %v25_v5 = vld [vmem:[%s2734_s0 + $0x38] sm:$0xff]  ;;  %v216_v6 = vsel %vm146_vm0, %v41_v4, 0.0  ;;  %v71_v8 = vld [vmem:[%s2734_s0 + $0x1a8] sm:$0xff]  ;;  %v261_v11 = vsel %vm146_vm0, %v56_v9, 0.0  ;;  %v86_v13 = vld [vmem:[%s2734_s0 + $0x220] sm:$0xff] }
  0x25   :  { %v168_v7 = vsel %vm146_vm0, %v25_v5, 0.0  ;;  %v306_v10 = vsel %vm146_vm0, %v71_v8, 0.0  ;;  %v101_v12 = vld [vmem:[%s2734_s0 + $0x298] sm:$0xff]  ;;  %v351_v15 = vsel %vm146_vm0, %v86_v13, 0.0  ;;  %v130_v16 = vld [vmem:[%s2734_s0 + $0x380] sm:$0xff]  ;;  %v116_v17 = vld [vmem:[%s2734_s0 + $0x310] sm:$0xff] }
  0x26   :  { %v396_v14 = vsel %vm146_vm0, %v101_v12, 0.0  ;;  %v483_v18 = vsel %vm146_vm0, %v130_v16, 0.0  ;;  %v441_v19 = vsel %vm146_vm0, %v116_v17, 0.0  ;;  %v26_v20 = vld [vmem:[%s2734_s0 + $0x40] sm:$0xff]  ;;  %v131_v21 = vld [vmem:[%s2734_s0 + $0x388] sm:$0xff]  ;;  %v57_v24 = vld [vmem:[%s2734_s0 + $0x138] sm:$0xff] }
  0x27   :  { %163 = vadd.xlane.f32.xlu1 %v162_v38  ;;  %v171_v22 = vsel %vm146_vm0, %v26_v20, 0.0  ;;  %v486_v23 = vsel %vm146_vm0, %v131_v21, 0.0  ;;  %v42_v25 = vld [vmem:[%s2734_s0 + $0xc0] sm:$0xff]  ;;  %v264_v26 = vsel %vm146_vm0, %v57_v24, 0.0  ;;  %v87_v28 = vld [vmem:[%s2734_s0 + $0x228] sm:$0xff]  ;;  %v72_v29 = vld [vmem:[%s2734_s0 + $0x1b0] sm:$0xff] }
  0x28   :  { %343 = vadd.xlane.f32.xlu0 %v342_v39  ;;  %v219_v27 = vsel %vm146_vm0, %v42_v25, 0.0  ;;  %v354_v30 = vsel %vm146_vm0, %v87_v28, 0.0  ;;  %v309_v31 = vsel %vm146_vm0, %v72_v29, 0.0  ;;  %v117_v32 = vld [vmem:[%s2734_s0 + $0x318] sm:$0xff]  ;;  %v102_v33 = vld [vmem:[%s2734_s0 + $0x2a0] sm:$0xff]  ;;  %v27_v36 = vld [vmem:[%s2734_s0 + $0x48] sm:$0xff] }
  0x29   :  { %v444_v34 = vsel %vm146_vm0, %v117_v32, 0.0  ;;  %v399_v35 = vsel %vm146_vm0, %v102_v33, 0.0  ;;  %v132_v37 = vld [vmem:[%s2734_s0 + $0x390] sm:$0xff]  ;;  %v174_v38 = vsel %vm146_vm0, %v27_v36, 0.0  ;;  %v58_v40 = vld [vmem:[%s2734_s0 + $0x140] sm:$0xff]  ;;  %v43_v41 = vld [vmem:[%s2734_s0 + $0xc8] sm:$0xff] }
  0x2a   :  { %v489_v39 = vsel %vm146_vm0, %v132_v37, 0.0  ;;  %v88_v44 = vld [vmem:[%s2734_s0 + $0x230] sm:$0xff]  ;;  %v73_v45 = vld [vmem:[%s2734_s0 + $0x1b8] sm:$0xff]  ;;  %v118_v48 = vld [vmem:[%s2734_s0 + $0x320] sm:$0xff]  ;;  %vm819_vm4 = vcmask 326912   ;;  %vm826_vm5 = vcmask 392512  }
  0x2b   :  { %256 = vadd.xlane.f32.xlu1 %v255_v42  ;;  %v267_v42 = vsel %vm146_vm0, %v58_v40, 0.0  ;;  %v103_v49 = vld [vmem:[%s2734_s0 + $0x2a8] sm:$0xff]  ;;  %v28_v52 = vld [vmem:[%s2734_s0 + $0x50] sm:$0xff]  ;;  %v133_v53 = vld [vmem:[%s2734_s0 + $0x398] sm:$0xff]  ;;  %vm833_vm6 = vcmask 458112   ;;  %vm840_vm7 = vcmask 523712  }
  0x2c   :  { %211 = vadd.xlane.f32.xlu0 %v210_v43  ;;  %v222_v43 = vsel %vm146_vm0, %v43_v41, 0.0  ;;  %v59_v56 = vld [vmem:[%s2734_s0 + $0x148] sm:$0xff]  ;;  %v44_v57 = vld [vmem:[%s2734_s0 + $0xd0] sm:$0xff]  ;;  %v89_v60 = vld [vmem:[%s2734_s0 + $0x238] sm:$0xff]  ;;  %vm847_vm8 = vcmask 589312   ;;  %vm854_vm9 = vcmask 654912  }
  0x2d   :  { %v74_v61 = vld [vmem:[%s2734_s0 + $0x1c0] sm:$0xff]  ;;  %v119_v0 = vld [vmem:[%s2734_s0 + $0x328] sm:$0xff]  ;;  %v104_v1 = vld [vmem:[%s2734_s0 + $0x2b0] sm:$0xff]  ;;  %vm861_vm10 = vcmask 720512   ;;  %vm1720_vm11 = vmmov 0   ;;  %vm868_vm12 = vcmask 786112  }
  0x2e   :  { %v29_v4 = vld [vmem:[%s2734_s0 + $0x58] sm:$0xff]  ;;  %v134_v5 = vld [vmem:[%s2734_s0 + $0x3a0] sm:$0xff]  ;;  %v60_v8 = vld [vmem:[%s2734_s0 + $0x150] sm:$0xff]  ;;  %vm875_vm13 = vcmask 851712   ;;  %vm882_vm14 = vcmask 917312   ;;  %vm889_vm15 = vcmask 982912  }
  0x2f   :  { %346 = vadd.xlane.f32.xlu1 %v345_v46  ;;  %v357_v46 = vsel %vm146_vm0, %v88_v44, 0.0  ;;  %v45_v9 = vld [vmem:[%s2734_s0 + $0xd8] sm:$0xff]  ;;  %v90_v12 = vld [vmem:[%s2734_s0 + $0x240] sm:$0xff]  ;;  %v75_v13 = vld [vmem:[%s2734_s0 + $0x1c8] sm:$0xff] }
  0x30   :  { %301 = vadd.xlane.f32.xlu0 %v300_v47  ;;  %v312_v47 = vsel %vm146_vm0, %v73_v45, 0.0  ;;  %v318_v16 = vsel %vm146_vm0, %v75_v13, 0.0  ;;  %v46_v40 = vld [vmem:[%s2734_s0 + $0xe0] sm:$0xff] }
  0x33   :  { %391 = vadd.xlane.f32.xlu1 %v390_v50  ;;  %v447_v50 = vsel %vm146_vm0, %v118_v48, 0.0 }
  0x34   :  { %388 = vadd.xlane.f32.xlu0 %v387_v51  ;;  %v402_v51 = vsel %vm146_vm0, %v103_v49, 0.0  ;;  %v231_v49 = vsel %vm146_vm0, %v46_v40, 0.0 }
  0x37   :  { %214 = vadd.xlane.f32.xlu1 %v213_v54  ;;  %v177_v54 = vsel %vm146_vm0, %v28_v52, 0.0 }
  0x38   :  { %166 = vadd.xlane.f32.xlu0 %v165_v55  ;;  %v492_v55 = vsel %vm146_vm0, %v133_v53, 0.0 }
  0x3b   :  { %304 = vadd.xlane.f32.xlu1 %v303_v58  ;;  %v270_v58 = vsel %vm146_vm0, %v59_v56, 0.0 }
  0x3c   :  { %259 = vadd.xlane.f32.xlu0 %v258_v59  ;;  %v225_v59 = vsel %vm146_vm0, %v44_v57, 0.0 }
  0x3f   :  { %394 = vadd.xlane.f32.xlu1 %v393_v62  ;;  %v360_v62 = vsel %vm146_vm0, %v89_v60, 0.0 }
  0x40   :  { %349 = vadd.xlane.f32.xlu0 %v348_v63  ;;  %v315_v63 = vsel %vm146_vm0, %v74_v61, 0.0 }
  0x43   :  { %439 = vadd.xlane.f32.xlu1 %v438_v2  ;;  %v450_v2 = vsel %vm146_vm0, %v119_v0, 0.0 }
  0x44   :  { %436 = vadd.xlane.f32.xlu0 %v435_v3  ;;  %v405_v3 = vsel %vm146_vm0, %v104_v1, 0.0 }
  0x47   :  { %217 = vadd.xlane.f32.xlu1 %v216_v6  ;;  %v180_v6 = vsel %vm146_vm0, %v29_v4, 0.0  ;;  %v106_v4 = vld [vmem:[%s2734_s0 + $0x2c0] sm:$0xff] }
  0x48   :  { %169 = vadd.xlane.f32.xlu0 %v168_v7  ;;  %v495_v7 = vsel %vm146_vm0, %v134_v5, 0.0 }
  0x4b   :  { %307 = vadd.xlane.f32.xlu1 %v306_v10  ;;  %v273_v10 = vsel %vm146_vm0, %v60_v8, 0.0 }
  0x4c   :  { %262 = vadd.xlane.f32.xlu0 %v261_v11  ;;  %v228_v11 = vsel %vm146_vm0, %v45_v9, 0.0 }
  0x4f   :  { %397 = vadd.xlane.f32.xlu1 %v396_v14  ;;  %v787_v14 = vlaneseq }
  0x50   :  { %352 = vadd.xlane.f32.xlu0 %v351_v15  ;;  %v363_v15 = vsel %vm146_vm0, %v90_v12, 0.0 }
  0x51   :  { %v2037_v17 = vand.u32 127, %v787_v14  ;;  %v2045_v20 = vshrl.u32 %v787_v14, 7 }
  0x53   :  { %484 = vadd.xlane.f32.xlu1 %v483_v18  ;;  %v120_v18 = vld [vmem:[%s2734_s0 + $0x330] sm:$0xff]  ;;  %v793_v21 = vadd.s32 4294967288, %v2037_v17  ;;  %v2058_v28 = vsub.s32 %v2037_v17, %v2045_v20 }
  0x54   :  { %442 = vadd.xlane.f32.xlu0 %v441_v19  ;;  %v105_v19 = vld [vmem:[%s2734_s0 + $0x2b8] sm:$0xff]  ;;  %v453_v24 = vsel %vm146_vm0, %v120_v18, 0.0 }
  0x55   :  { %v408_v25 = vsel %vm146_vm0, %v105_v19, 0.0  ;;  %v2062_v32 = vsub.s32 %v793_v21, %v2045_v20  ;;  %v814_v21 = vadd.s32 4294967264, %v2037_v17 }
  0x57   :  { %172 = vadd.xlane.f32.xlu1 %v171_v22 }
  0x58   :  { %487 = vadd.xlane.f32.xlu0 %v486_v23 }
  0x5b   :  { %265 = vadd.xlane.f32.xlu1 %v264_v26  ;;  %v30_v26 = vld [vmem:[%s2734_s0 + $0x60] sm:$0xff] }
  0x5c   :  { %220 = vadd.xlane.f32.xlu0 %v219_v27  ;;  %v135_v27 = vld [vmem:[%s2734_s0 + $0x3a8] sm:$0xff] }
  0x5d   :  { %v498_v36 = vsel %vm146_vm0, %v135_v27, 0.0 }
  0x5f   :  { %355 = vadd.xlane.f32.xlu1 %v354_v30  ;;  %v800_v30 = vadd.s32 4294967280, %v2037_v17 }
  0x60   :  { %310 = vadd.xlane.f32.xlu0 %v309_v31 }
  0x63   :  { %445 = vadd.xlane.f32.xlu1 %v444_v34 }
  0x64   :  { %400 = vadd.xlane.f32.xlu0 %v399_v35  ;;  %v183_v35 = vsel %vm146_vm0, %v30_v26, 0.0 }
  0x67   :  { %175 = vadd.xlane.f32.xlu1 %v174_v38 }
  0x68   :  { %490 = vadd.xlane.f32.xlu0 %v489_v39  ;;  %v61_v39 = vld [vmem:[%s2734_s0 + $0x158] sm:$0xff] }
  0x69   :  { %v276_v48 = vsel %vm146_vm0, %v61_v39, 0.0 }
  0x6b   :  { %268 = vadd.xlane.f32.xlu1 %v267_v42  ;;  %v2074_v42 = vsub.s32 %v800_v30, %v2045_v20  ;;  %v62_v30 = vld [vmem:[%s2734_s0 + $0x160] sm:$0xff] }
  0x6c   :  { %223 = vadd.xlane.f32.xlu0 %v222_v43 }
  0x6f   :  { %358 = vadd.xlane.f32.xlu1 %v357_v46 }
  0x70   :  { %313 = vadd.xlane.f32.xlu0 %v312_v47 }
  0x73   :  { %448 = vadd.xlane.f32.xlu1 %v447_v50 }
  0x74   :  { %403 = vadd.xlane.f32.xlu0 %v402_v51 }
  0x77   :  { %178 = vadd.xlane.f32.xlu1 %v177_v54  ;;  %v91_v54 = vld [vmem:[%s2734_s0 + $0x248] sm:$0xff] }
  0x78   :  { %493 = vadd.xlane.f32.xlu0 %v492_v55  ;;  %v76_v55 = vld [vmem:[%s2734_s0 + $0x1d0] sm:$0xff]  ;;  %v366_v61 = vsel %vm146_vm0, %v91_v54, 0.0 }
  0x7b   :  { %271 = vadd.xlane.f32.xlu1 %v270_v58  ;;  %v807_v58 = vadd.s32 4294967272, %v2037_v17 }
  0x7c   :  { %226 = vadd.xlane.f32.xlu0 %v225_v59 }
  0x7f   :  { %361 = vadd.xlane.f32.xlu1 %v360_v62  ;;  %v321_v62 = vsel %vm146_vm0, %v76_v55, 0.0 }
  0x80   :  { %316 = vadd.xlane.f32.xlu0 %v315_v63 }
  0x83   :  { %451 = vadd.xlane.f32.xlu1 %v450_v2 }
  0x84   :  { %406 = vadd.xlane.f32.xlu0 %v405_v3  ;;  %v121_v3 = vld [vmem:[%s2734_s0 + $0x338] sm:$0xff] }
  0x87   :  { %181 = vadd.xlane.f32.xlu1 %v180_v6 }
  0x88   :  { %496 = vadd.xlane.f32.xlu0 %v495_v7  ;;  %v2105_v7 = vsub.s32 %v807_v58, %v2045_v20  ;;  %v107_v58 = vld [vmem:[%s2734_s0 + $0x2c8] sm:$0xff] }
  0x8b   :  { %274 = vadd.xlane.f32.xlu1 %v273_v10  ;;  %v456_v10 = vsel %vm146_vm0, %v121_v3, 0.0 }
  0x8c   :  { %229 = vadd.xlane.f32.xlu0 %v228_v11  ;;  %v411_v11 = vsel %vm146_vm0, %v106_v4, 0.0 }
  0x8f   :  { %364 = vadd.xlane.f32.xlu1 %v363_v15  ;;  %v31_v15 = vld [vmem:[%s2734_s0 + $0x68] sm:$0xff] }
  0x90   :  { %319 = vadd.xlane.f32.xlu0 %v318_v16  ;;  %v197_v22 = vpop.xlane.xlu1 %196  ;;  %v136_v16 = vld [vmem:[%s2734_s0 + $0x3b0] sm:$0xff] }
  0x91   :  { %v149_v23 = vpop.xlane.xlu0 %148  ;;  %v547_v29 = vmul.f32 0.0625, %v197_v22 }
  0x92   :  { %v531_v31 = vmul.f32 0.0625, %v149_v23 }
  0x93   :  { %454 = vadd.xlane.f32.xlu1 %v453_v24  ;;  %v901_v41 = vrot.slane %v547_v29, %v2058_v28  ;;  %v186_v24 = vsel %vm146_vm0, %v31_v15, 0.0 }
  0x94   :  { %409 = vadd.xlane.f32.xlu0 %v408_v25  ;;  %v200_v33 = vpop.xlane.xlu1 %199  ;;  %v792_v43 = vrot.slane %v531_v31, %v2058_v28  ;;  %v501_v25 = vsel %vm146_vm0, %v136_v16, 0.0  ;;  %v47_v31 = vld [vmem:[%s2734_s0 + $0xe8] sm:$0xff] }
  0x95   :  { %v152_v34 = vpop.xlane.xlu0 %151  ;;  %v548_v37 = vmul.f32 0.0625, %v200_v33  ;;  %v234_v39 = vsel %vm146_vm0, %v47_v31, 0.0 }
  0x96   :  { %v532_v38 = vmul.f32 0.0625, %v152_v34 }
  0x97   :  { %v905_v44 = vrot.slane %v548_v37, %v2062_v32  ;;  %184 = vadd.xlane.f32.xlu1 %v183_v35  ;;  %v2131_v35 = vsub.s32 %v814_v21, %v2045_v20  ;;  %v48_v21 = vld [vmem:[%s2734_s0 + $0xf0] sm:$0xff] }
  0x98   :  { %v797_v45 = vrot.slane %v532_v38, %v2062_v32  ;;  %499 = vadd.xlane.f32.xlu0 %v498_v36  ;;  %v203_v46 = vpop.xlane.xlu1 %202  ;;  %v279_v38 = vsel %vm146_vm0, %v62_v30, 0.0 }
  0x99   :  { %v155_v47 = vpop.xlane.xlu0 %154  ;;  %v906_v50 = vsel %vm798_vm1, %v905_v44, %v901_v41  ;;  %v549_v52 = vmul.f32 0.0625, %v203_v46  ;;  %v92_v44 = vld [vmem:[%s2734_s0 + $0x250] sm:$0xff] }
  0x9a   :  { %v799_v51 = vsel %vm798_vm1, %v797_v45, %v792_v43  ;;  %v533_v53 = vmul.f32 0.0625, %v155_v47  ;;  %v77_v45 = vld [vmem:[%s2734_s0 + $0x1d8] sm:$0xff] }
  0x9b   :  { %v910_v56 = vrot.slane %v549_v52, %v2074_v42  ;;  %277 = vadd.xlane.f32.xlu1 %v276_v48  ;;  %v324_v52 = vsel %vm146_vm0, %v77_v45, 0.0 }
  0x9c   :  { %v804_v57 = vrot.slane %v533_v53, %v2074_v42  ;;  %232 = vadd.xlane.f32.xlu0 %v231_v49  ;;  %v248_v59 = vpop.xlane.xlu1 %247 }
  0x9d   :  { %v245_v60 = vpop.xlane.xlu0 %244  ;;  %v911_v63 = vsel %vm805_vm2, %v910_v56, %v906_v50  ;;  %v564_v1 = vmul.f32 0.0625, %v248_v59 }
  0x9e   :  { %v806_v0 = vsel %vm805_vm2, %v804_v57, %v799_v51  ;;  %v563_v2 = vmul.f32 0.0625, %v245_v60  ;;  %v369_v51 = vsel %vm146_vm0, %v92_v44, 0.0  ;;  %v122_v57 = vld [vmem:[%s2734_s0 + $0x340] sm:$0xff] }
  0x9f   :  { %v984_v5 = vrot.slane %v564_v1, %v2062_v32  ;;  %367 = vadd.xlane.f32.xlu1 %v366_v61  ;;  %v821_v61 = vadd.s32 4294967256, %v2037_v17  ;;  %v414_v1 = vsel %vm146_vm0, %v107_v58, 0.0 }
  0xa0   :  { %v980_v6 = vrot.slane %v563_v2, %v2058_v28  ;;  %322 = vadd.xlane.f32.xlu0 %v321_v62  ;;  %v206_v8 = vpop.xlane.xlu1 %205 }
  0xa1   :  { %v158_v9 = vpop.xlane.xlu0 %157  ;;  %v550_v13 = vmul.f32 0.0625, %v206_v8 }
  0xa2   :  { %v985_v12 = vsel %vm798_vm1, %v984_v5, %v980_v6  ;;  %v534_v14 = vmul.f32 0.0625, %v158_v9  ;;  %v32_v5 = vld [vmem:[%s2734_s0 + $0x70] sm:$0xff]  ;;  %v137_v6 = vld [vmem:[%s2734_s0 + $0x3b8] sm:$0xff] }
  0xa3   :  { %v915_v18 = vrot.slane %v550_v13, %v2105_v7  ;;  %457 = vadd.xlane.f32.xlu1 %v456_v10  ;;  %v2170_v10 = vsub.s32 %v821_v61, %v2045_v20  ;;  %v189_v13 = vsel %vm146_vm0, %v32_v5, 0.0 }
  0xa4   :  { %v811_v19 = vrot.slane %v534_v14, %v2105_v7  ;;  %412 = vadd.xlane.f32.xlu0 %v411_v11  ;;  %v293_v22 = vpop.xlane.xlu1 %292  ;;  %v504_v14 = vsel %vm146_vm0, %v137_v6, 0.0 }
  0xa5   :  { %v251_v23 = vpop.xlane.xlu0 %250  ;;  %v916_v26 = vsel %vm812_vm3, %v915_v18, %v911_v63  ;;  %v579_v33 = vmul.f32 0.0625, %v293_v22 }
  0xa6   :  { %v813_v27 = vsel %vm812_vm3, %v811_v19, %v806_v0  ;;  %v565_v29 = vmul.f32 0.0625, %v251_v23  ;;  %v459_v0 = vsel %vm146_vm0, %v122_v57, 0.0  ;;  %v63_v19 = vld [vmem:[%s2734_s0 + $0x168] sm:$0xff] }
  0xa7   :  { %187 = vadd.xlane.f32.xlu1 %v186_v24  ;;  %v1059_v46 = vrot.slane %v579_v33, %v2058_v28 }
  0xa8   :  { %v989_v34 = vrot.slane %v565_v29, %v2074_v42  ;;  %502 = vadd.xlane.f32.xlu0 %v501_v25  ;;  %v161_v36 = vpop.xlane.xlu1 %160  ;;  %v237_v29 = vsel %vm146_vm0, %v48_v21, 0.0 }
  0xa9   :  { %v296_v37 = vpop.xlane.xlu0 %295  ;;  %v535_v41 = vmul.f32 0.0625, %v161_v36  ;;  %v93_v36 = vld [vmem:[%s2734_s0 + $0x258] sm:$0xff] }
  0xaa   :  { %v990_v40 = vsel %vm805_vm2, %v989_v34, %v985_v12  ;;  %v580_v43 = vmul.f32 0.0625, %v296_v37  ;;  %v78_v37 = vld [vmem:[%s2734_s0 + $0x1e0] sm:$0xff] }
  0xab   :  { %v818_v47 = vrot.slane %v535_v41, %v2131_v35  ;;  %280 = vadd.xlane.f32.xlu1 %v279_v38  ;;  %v327_v44 = vsel %vm146_vm0, %v78_v37, 0.0 }
  0xac   :  { %v1063_v48 = vrot.slane %v580_v43, %v2062_v32  ;;  %235 = vadd.xlane.f32.xlu0 %v234_v39  ;;  %v254_v49 = vpop.xlane.xlu1 %253  ;;  %v372_v43 = vsel %vm146_vm0, %v93_v36, 0.0 }
  0xad   :  { %v209_v50 = vpop.xlane.xlu0 %208  ;;  %v820_v53 = vsel %vm819_vm4, %v818_v47, %v813_v27  ;;  %v566_v55 = vmul.f32 0.0625, %v254_v49  ;;  %v282_v27 = vsel %vm146_vm0, %v63_v19, 0.0  ;;  %v123_v49 = vld [vmem:[%s2734_s0 + $0x348] sm:$0xff] }
  0xae   :  { %v1064_v54 = vsel %vm798_vm1, %v1063_v48, %v1059_v46  ;;  %v551_v56 = vmul.f32 0.0625, %v209_v50  ;;  %v108_v50 = vld [vmem:[%s2734_s0 + $0x2d0] sm:$0xff] }
  0xaf   :  { %v994_v59 = vrot.slane %v566_v55, %v2105_v7  ;;  %370 = vadd.xlane.f32.xlu1 %v369_v51  ;;  %v417_v57 = vsel %vm146_vm0, %v108_v50, 0.0 }
  0xb0   :  { %v920_v60 = vrot.slane %v551_v56, %v2131_v35  ;;  %325 = vadd.xlane.f32.xlu0 %v324_v52  ;;  %v341_v62 = vpop.xlane.xlu1 %340  ;;  %v462_v56 = vsel %vm146_vm0, %v123_v49, 0.0 }
  0xb1   :  { %v299_v63 = vpop.xlane.xlu0 %298  ;;  %v995_v2 = vsel %vm812_vm3, %v994_v59, %v990_v40  ;;  %v595_v8 = vmul.f32 0.0625, %v341_v62  ;;  %v33_v62 = vld [vmem:[%s2734_s0 + $0x78] sm:$0xff] }
  0xb2   :  { %v921_v3 = vsel %vm819_vm4, %v920_v60, %v916_v26  ;;  %v581_v4 = vmul.f32 0.0625, %v299_v63  ;;  %v138_v63 = vld [vmem:[%s2734_s0 + $0x3c0] sm:$0xff]  ;;  %v192_v5 = vsel %vm146_vm0, %v33_v62, 0.0 }
  0xb3   :  { %460 = vadd.xlane.f32.xlu1 %v459_v0  ;;  %v1138_v22 = vrot.slane %v595_v8, %v2058_v28  ;;  %v507_v6 = vsel %vm146_vm0, %v138_v63, 0.0 }
  0xb4   :  { %v1068_v9 = vrot.slane %v581_v4, %v2074_v42  ;;  %415 = vadd.xlane.f32.xlu0 %v414_v1  ;;  %v164_v11 = vpop.xlane.xlu1 %163 }
  0xb5   :  { %v344_v12 = vpop.xlane.xlu0 %343  ;;  %v536_v16 = vmul.f32 0.0625, %v164_v11 }
  0xb6   :  { %v1069_v15 = vsel %vm805_vm2, %v1068_v9, %v1064_v54  ;;  %v596_v18 = vmul.f32 0.0625, %v344_v12  ;;  %v64_v12 = vld [vmem:[%s2734_s0 + $0x170] sm:$0xff] }
  0xb7   :  { %v825_v23 = vrot.slane %v536_v16, %v2170_v10  ;;  %190 = vadd.xlane.f32.xlu1 %v189_v13  ;;  %v49_v13 = vld [vmem:[%s2734_s0 + $0xf8] sm:$0xff]  ;;  %v285_v19 = vsel %vm146_vm0, %v64_v12, 0.0 }
  0xb8   :  { %v1142_v24 = vrot.slane %v596_v18, %v2062_v32  ;;  %505 = vadd.xlane.f32.xlu0 %v504_v14  ;;  %v257_v25 = vpop.xlane.xlu1 %256  ;;  %v240_v21 = vsel %vm146_vm0, %v49_v13, 0.0 }
  0xb9   :  { %v212_v26 = vpop.xlane.xlu0 %211  ;;  %v827_v30 = vsel %vm826_vm5, %v825_v23, %v820_v53  ;;  %v567_v33 = vmul.f32 0.0625, %v257_v25  ;;  %v828_v53 = vadd.s32 4294967248, %v2037_v17 }
  0xba   :  { %v1143_v31 = vsel %vm798_vm1, %v1142_v24, %v1138_v22  ;;  %v552_v34 = vmul.f32 0.0625, %v212_v26  ;;  %v94_v26 = vld [vmem:[%s2734_s0 + $0x260] sm:$0xff] }
  0xbb   :  { %v999_v38 = vrot.slane %v567_v33, %v2131_v35  ;;  %283 = vadd.xlane.f32.xlu1 %v282_v27  ;;  %v79_v27 = vld [vmem:[%s2734_s0 + $0x1e8] sm:$0xff] }
  0xbc   :  { %v925_v39 = vrot.slane %v552_v34, %v2170_v10  ;;  %238 = vadd.xlane.f32.xlu0 %v237_v29  ;;  %v347_v40 = vpop.xlane.xlu1 %346  ;;  %v330_v36 = vsel %vm146_vm0, %v79_v27, 0.0 }
  0xbd   :  { %v302_v41 = vpop.xlane.xlu0 %301  ;;  %v1000_v45 = vsel %vm819_vm4, %v999_v38, %v995_v2  ;;  %v597_v47 = vmul.f32 0.0625, %v347_v40  ;;  %v2222_v2 = vsub.s32 %v828_v53, %v2045_v20 }
  0xbe   :  { %v926_v46 = vsel %vm826_vm5, %v925_v39, %v921_v3  ;;  %v582_v48 = vmul.f32 0.0625, %v302_v41  ;;  %v124_v41 = vld [vmem:[%s2734_s0 + $0x350] sm:$0xff] }
  0xbf   :  { %v1147_v51 = vrot.slane %v597_v47, %v2074_v42  ;;  %373 = vadd.xlane.f32.xlu1 %v372_v43  ;;  %v109_v43 = vld [vmem:[%s2734_s0 + $0x2d8] sm:$0xff]  ;;  %v835_v47 = vadd.s32 4294967240, %v2037_v17  ;;  %v465_v49 = vsel %vm146_vm0, %v124_v41, 0.0 }
  0xc0   :  { %v1073_v52 = vrot.slane %v582_v48, %v2105_v7  ;;  %328 = vadd.xlane.f32.xlu0 %v327_v44  ;;  %v392_v54 = vpop.xlane.xlu1 %391  ;;  %v420_v50 = vsel %vm146_vm0, %v109_v43, 0.0 }
  0xc1   :  { %v389_v55 = vpop.xlane.xlu0 %388  ;;  %v1148_v58 = vsel %vm805_vm2, %v1147_v51, %v1143_v31  ;;  %v612_v60 = vmul.f32 0.0625, %v392_v54 }
  0xc2   :  { %v1074_v59 = vsel %vm812_vm3, %v1073_v52, %v1069_v15  ;;  %v611_v61 = vmul.f32 0.0625, %v389_v55  ;;  %v65_v55 = vld [vmem:[%s2734_s0 + $0x178] sm:$0xff] }
  0xc3   :  { %v1221_v0 = vrot.slane %v612_v60, %v2062_v32  ;;  %463 = vadd.xlane.f32.xlu1 %v462_v56  ;;  %v139_v56 = vld [vmem:[%s2734_s0 + $0x3c8] sm:$0xff]  ;;  %v2273_v60 = vsub.s32 %v835_v47, %v2045_v20  ;;  %v288_v62 = vsel %vm146_vm0, %v65_v55, 0.0 }
  0xc4   :  { %v1217_v1 = vrot.slane %v611_v61, %v2058_v28  ;;  %418 = vadd.xlane.f32.xlu0 %v417_v57  ;;  %v215_v3 = vpop.xlane.xlu1 %214  ;;  %v510_v63 = vsel %vm146_vm0, %v139_v56, 0.0 }
  0xc5   :  { %v167_v4 = vpop.xlane.xlu0 %166  ;;  %v553_v9 = vmul.f32 0.0625, %v215_v3 }
  0xc6   :  { %v1222_v8 = vsel %vm798_vm1, %v1221_v0, %v1217_v1  ;;  %v537_v11 = vmul.f32 0.0625, %v167_v4  ;;  %v95_v4 = vld [vmem:[%s2734_s0 + $0x268] sm:$0xff] }
  0xc7   :  { %v930_v14 = vrot.slane %v553_v9, %v2222_v2  ;;  %193 = vadd.xlane.f32.xlu1 %v192_v5  ;;  %v80_v5 = vld [vmem:[%s2734_s0 + $0x1f0] sm:$0xff]  ;;  %v378_v12 = vsel %vm146_vm0, %v95_v4, 0.0 }
  0xc8   :  { %v832_v15 = vrot.slane %v537_v11, %v2222_v2  ;;  %508 = vadd.xlane.f32.xlu0 %v507_v6  ;;  %v305_v16 = vpop.xlane.xlu1 %304  ;;  %v333_v13 = vsel %vm146_vm0, %v80_v5, 0.0 }
  0xc9   :  { %v260_v18 = vpop.xlane.xlu0 %259  ;;  %v931_v22 = vsel %vm833_vm6, %v930_v14, %v926_v46  ;;  %v583_v24 = vmul.f32 0.0625, %v305_v16 }
  0xca   :  { %v834_v23 = vsel %vm833_vm6, %v832_v15, %v827_v30  ;;  %v568_v25 = vmul.f32 0.0625, %v260_v18  ;;  %v375_v30 = vsel %vm146_vm0, %v94_v26, 0.0 }
  0xcb   :  { %v1078_v29 = vrot.slane %v583_v24, %v2131_v35  ;;  %286 = vadd.xlane.f32.xlu1 %v285_v19  ;;  %v125_v19 = vld [vmem:[%s2734_s0 + $0x358] sm:$0xff] }
  0xcc   :  { %v1004_v31 = vrot.slane %v568_v25, %v2170_v10  ;;  %241 = vadd.xlane.f32.xlu0 %v240_v21  ;;  %v395_v33 = vpop.xlane.xlu1 %394  ;;  %v110_v21 = vld [vmem:[%s2734_s0 + $0x2e0] sm:$0xff] }
  0xcd   :  { %v350_v34 = vpop.xlane.xlu0 %349  ;;  %v1079_v37 = vsel %vm819_vm4, %v1078_v29, %v1074_v59  ;;  %v613_v39 = vmul.f32 0.0625, %v395_v33  ;;  %v423_v27 = vsel %vm146_vm0, %v110_v21, 0.0 }
  0xce   :  { %v1005_v38 = vsel %vm826_vm5, %v1004_v31, %v1000_v45  ;;  %v598_v40 = vmul.f32 0.0625, %v350_v34 }
  0xcf   :  { %v1226_v44 = vrot.slane %v613_v39, %v2074_v42  ;;  %376 = vadd.xlane.f32.xlu1 %v375_v30  ;;  %v81_v30 = vld [vmem:[%s2734_s0 + $0x1f8] sm:$0xff] }
  0xd0   :  { %v1152_v46 = vrot.slane %v598_v40, %v2105_v7  ;;  %331 = vadd.xlane.f32.xlu0 %v330_v36  ;;  %v440_v48 = vpop.xlane.xlu1 %439  ;;  %v140_v36 = vld [vmem:[%s2734_s0 + $0x3d0] sm:$0xff]  ;;  %v336_v43 = vsel %vm146_vm0, %v81_v30, 0.0 }
  0xd1   :  { %v437_v45 = vpop.xlane.xlu0 %436  ;;  %v1227_v51 = vsel %vm805_vm2, %v1226_v44, %v1222_v8  ;;  %v628_v53 = vmul.f32 0.0625, %v440_v48  ;;  %v513_v44 = vsel %vm146_vm0, %v140_v36, 0.0 }
  0xd2   :  { %v1153_v52 = vsel %vm812_vm3, %v1152_v46, %v1148_v58  ;;  %v627_v54 = vmul.f32 0.0625, %v437_v45  ;;  %v111_v45 = vld [vmem:[%s2734_s0 + $0x2e8] sm:$0xff] }
  0xd3   :  { %v1300_v57 = vrot.slane %v628_v53, %v2062_v32  ;;  %466 = vadd.xlane.f32.xlu1 %v465_v49  ;;  %v96_v49 = vld [vmem:[%s2734_s0 + $0x270] sm:$0xff] }
  0xd4   :  { %v1296_v59 = vrot.slane %v627_v54, %v2058_v28  ;;  %421 = vadd.xlane.f32.xlu0 %v420_v50  ;;  %v218_v58 = vpop.xlane.xlu1 %217  ;;  %v381_v56 = vsel %vm146_vm0, %v96_v49, 0.0 }
  0xd5   :  { %v170_v61 = vpop.xlane.xlu0 %169  ;;  %v554_v1 = vmul.f32 0.0625, %v218_v58 }
  0xd6   :  { %v1301_v0 = vsel %vm798_vm1, %v1300_v57, %v1296_v59  ;;  %v538_v3 = vmul.f32 0.0625, %v170_v61  ;;  %v141_v61 = vld [vmem:[%s2734_s0 + $0x3d8] sm:$0xff] }
  0xd7   :  { %v935_v6 = vrot.slane %v554_v1, %v2273_v60  ;;  %289 = vadd.xlane.f32.xlu1 %v288_v62  ;;  %v126_v62 = vld [vmem:[%s2734_s0 + $0x360] sm:$0xff]  ;;  %v516_v5 = vsel %vm146_vm0, %v141_v61, 0.0 }
  0xd8   :  { %v839_v8 = vrot.slane %v538_v3, %v2273_v60  ;;  %511 = vadd.xlane.f32.xlu0 %v510_v63  ;;  %v308_v9 = vpop.xlane.xlu1 %307 }
  0xd9   :  { %v263_v11 = vpop.xlane.xlu0 %262  ;;  %v2289_v14 = vsel %vm840_vm7, %v935_v6, %v931_v22  ;;  %v584_v16 = vmul.f32 0.0625, %v308_v9  ;;  %v471_v6 = vsel %vm146_vm0, %v126_v62, 0.0 }
  0xda   :  { %v841_v15 = vsel %vm840_vm7, %v839_v8, %v834_v23  ;;  %v569_v18 = vmul.f32 0.0625, %v263_v11  ;;  %v468_v23 = vsel %vm146_vm0, %v125_v19, 0.0 }
  0xdb   :  { %v1083_v24 = vrot.slane %v584_v16, %v2170_v10  ;;  %379 = vadd.xlane.f32.xlu1 %v378_v12  ;;  %v97_v12 = vld [vmem:[%s2734_s0 + $0x278] sm:$0xff] }
  0xdc   :  { %v1009_v25 = vrot.slane %v569_v18, %v2222_v2  ;;  %334 = vadd.xlane.f32.xlu0 %v333_v13  ;;  %v398_v22 = vpop.xlane.xlu1 %397  ;;  %v384_v21 = vsel %vm146_vm0, %v97_v12, 0.0 }
  0xdd   :  { %v353_v26 = vpop.xlane.xlu0 %352  ;;  %v2303_v29 = vsel %vm826_vm5, %v1083_v24, %v1079_v37  ;;  %v614_v33 = vmul.f32 0.0625, %v398_v22  ;;  %v842_v37 = vadd.s32 4294967232, %v2037_v17 }
  0xde   :  { %v1010_v31 = vsel %vm833_vm6, %v1009_v25, %v1005_v38  ;;  %v599_v34 = vmul.f32 0.0625, %v353_v26 }
  0xdf   :  { %v1231_v39 = vrot.slane %v614_v33, %v2105_v7  ;;  %469 = vadd.xlane.f32.xlu1 %v468_v23  ;;  %v2329_v54 = vsub.s32 %v842_v37, %v2045_v20  ;;  %v142_v23 = vld [vmem:[%s2734_s0 + $0x3e0] sm:$0xff]  ;;  %v849_v33 = vadd.s32 4294967224, %v2037_v17 }
  0xe0   :  { %v1157_v40 = vrot.slane %v599_v34, %v2131_v35  ;;  %424 = vadd.xlane.f32.xlu0 %v423_v27  ;;  %v485_v41 = vpop.xlane.xlu1 %484  ;;  %v127_v27 = vld [vmem:[%s2734_s0 + $0x368] sm:$0xff]  ;;  %v519_v36 = vsel %vm146_vm0, %v142_v23, 0.0 }
  0xe1   :  { %v443_v38 = vpop.xlane.xlu0 %442  ;;  %v2318_v46 = vsel %vm812_vm3, %v1231_v39, %v1227_v51  ;;  %v643_v50 = vmul.f32 0.0625, %v485_v41  ;;  %v474_v39 = vsel %vm146_vm0, %v127_v27, 0.0 }
  0xe2   :  { %v1158_v47 = vsel %vm819_vm4, %v1157_v40, %v1153_v52  ;;  %v629_v48 = vmul.f32 0.0625, %v443_v38  ;;  %v426_v52 = vsel %vm146_vm0, %v111_v45, 0.0 }
  0xe3   :  { %337 = vadd.xlane.f32.xlu1 %v336_v43  ;;  %v1375_v63 = vrot.slane %v643_v50, %v2058_v28  ;;  %v128_v43 = vld [vmem:[%s2734_s0 + $0x370] sm:$0xff] }
  0xe4   :  { %v1305_v53 = vrot.slane %v629_v48, %v2074_v42  ;;  %514 = vadd.xlane.f32.xlu0 %v513_v44  ;;  %v173_v51 = vpop.xlane.xlu1 %172  ;;  %v113_v44 = vld [vmem:[%s2734_s0 + $0x2f8] sm:$0xff]  ;;  %v2395_v48 = vsub.s32 %v849_v33, %v2045_v20 }
  0xe5   :  { %v488_v55 = vpop.xlane.xlu0 %487  ;;  %v539_v59 = vmul.f32 0.0625, %v173_v51 }
  0xe6   :  { %v2334_v57 = vsel %vm805_vm2, %v1305_v53, %v1301_v0  ;;  %v644_v58 = vmul.f32 0.0625, %v488_v55  ;;  %v477_v55 = vsel %vm146_vm0, %v128_v43, 0.0 }
  0xe7   :  { %v846_v1 = vrot.slane %v539_v59, %v2329_v54  ;;  %427 = vadd.xlane.f32.xlu1 %v426_v52  ;;  %v432_v52 = vsel %vm146_vm0, %v113_v44, 0.0 }
  0xe8   :  { %v1379_v3 = vrot.slane %v644_v58, %v2062_v32  ;;  %382 = vadd.xlane.f32.xlu0 %v381_v56  ;;  %v266_v0 = vpop.xlane.xlu1 %265  ;;  %v112_v32 = vld [vmem:[%s2734_s0 + $0x2f0] sm:$0xff]  ;;  %v1719_v56 = vmov 0.0|0.0  }
  0xe9   :  { %v221_v4 = vpop.xlane.xlu0 %220  ;;  %v2348_v8 = vsel %vm847_vm8, %v846_v1, %v841_v15  ;;  %v570_v11 = vmul.f32 0.0625, %v266_v0  ;;  %v429_v19 = vsel %vm146_vm0, %v112_v32, 0.0  ;;  %1642 = vmatprep.subr.bf16.mxu0 %v1719_v56  ;;  %v143_v1 = vld [vmem:[%s2734_s0 + $0x3e8] sm:$0xff] }
  0xea   :  { %v2351_v9 = vsel %vm798_vm1, %v1379_v3, %v1375_v63  ;;  %v555_v28 = vmul.f32 0.0625, %v221_v4  ;;  %v129_v63 = vld [vmem:[%s2734_s0 + $0x378] sm:$0xff]  ;;  %vm1451_vm1 = vcmask 1041409  }
  0xeb   :  { %v1014_v13 = vrot.slane %v570_v11, %v2273_v60  ;;  %517 = vadd.xlane.f32.xlu1 %v516_v5  ;;  %v480_v11 = vsel %vm146_vm0, %v129_v63, 0.0 }
  0xec   :  { %v940_v16 = vrot.slane %v555_v28, %v2329_v54  ;;  %472 = vadd.xlane.f32.xlu0 %v471_v6  ;;  %v356_v15 = vpop.xlane.xlu1 %355  ;;  %v522_v28 = vsel %vm146_vm0, %v143_v1, 0.0 }
  0xed   :  { %v311_v18 = vpop.xlane.xlu0 %310  ;;  %v2364_v24 = vsel %vm840_vm7, %v1014_v13, %v1010_v31  ;;  %v600_v22 = vmul.f32 0.0625, %v356_v15  ;;  %v145_v15 = vld [vmem:[%s2734_s0 + $0x3f8] sm:$0xff] }
  0xee   :  { %v2368_v25 = vsel %vm847_vm8, %v940_v16, %v2289_v14  ;;  %v585_v26 = vmul.f32 0.0625, %v311_v18  ;;  %v528_v27 = vsel %vm146_vm0, %v145_v15, 0.0 }
  0xef   :  { %v1162_v34 = vrot.slane %v600_v22, %v2170_v10  ;;  %430 = vadd.xlane.f32.xlu1 %v429_v19 }
  0xf0   :  { %v1088_v31 = vrot.slane %v585_v26, %v2222_v2  ;;  %385 = vadd.xlane.f32.xlu0 %v384_v21  ;;  %v446_v14 = vpop.xlane.xlu1 %445 }
  0xf1   :  { %v401_v30 = vpop.xlane.xlu0 %400  ;;  %v2382_v40 = vsel %vm826_vm5, %v1162_v34, %v1158_v47  ;;  %v630_v41 = vmul.f32 0.0625, %v446_v14  ;;  %v1467_v47 = vld [vmem:[%s2735_s1] sm:$0xff] }
  0xf2   :  { %v2386_v37 = vsel %vm833_vm6, %v1088_v31, %v2303_v29  ;;  %v615_v38 = vmul.f32 0.0625, %v401_v30  ;;  %v1468_v29 = vld [vmem:[%s2735_s1 + $0x8] sm:$0xff]  ;;  %v1473_v30 = vld [vmem:[%s2735_s1 + $0x30] sm:$0xff] }
  0xf3   :  { %v1310_v45 = vrot.slane %v630_v41, %v2105_v7  ;;  %520 = vadd.xlane.f32.xlu1 %v519_v36  ;;  %v1643_v50 = vpack.c.bf16 %v1468_v29, %v1467_v47  ;;  %v1474_v36 = vld [vmem:[%s2735_s1 + $0x38] sm:$0xff] }
  0xf4   :  { %v1236_v49 = vrot.slane %v615_v38, %v2131_v35  ;;  %475 = vadd.xlane.f32.xlu0 %v474_v39  ;;  %v176_v53 = vpop.xlane.xlu1 %175  ;;  %v1652_v41 = vpack.c.bf16 %v1474_v36, %v1473_v30 }
  0xf5   :  { %v491_v51 = vpop.xlane.xlu0 %490  ;;  %v2410_v59 = vsel %vm812_vm3, %v1310_v45, %v2334_v57  ;;  %v540_v61 = vmul.f32 0.0625, %v176_v53  ;;  %1644 = vmatpush3.bf16.msra.mxu0 %v1643_v50  ;;  %v1469_v57 = vld [vmem:[%s2735_s1 + $0x10] sm:$0xff]  ;;  %v1476_v50 = vld [vmem:[%s2735_s1 + $0x48] sm:$0xff] }
  0xf6   :  { %v2414_v58 = vsel %vm819_vm4, %v1236_v49, %v2318_v46  ;;  %v645_v62 = vmul.f32 0.0625, %v491_v51  ;;  %1645 = vmatprep.subr.bf16.mxu0 %v1719_v56  ;;  %v1470_v46 = vld [vmem:[%s2735_s1 + $0x18] sm:$0xff]  ;;  %v1475_v49 = vld [vmem:[%s2735_s1 + $0x40] sm:$0xff] }
  0xf7   :  { %v853_v3 = vrot.slane %v540_v61, %v2395_v48  ;;  %478 = vadd.xlane.f32.xlu1 %v477_v55  ;;  %v1646_v4 = vpack.c.bf16 %v1470_v46, %v1469_v57  ;;  %v1477_v57 = vld [vmem:[%s2735_s1 + $0x50] sm:$0xff]  ;;  %v1478_v46 = vld [vmem:[%s2735_s1 + $0x58] sm:$0xff] }
  0xf8   :  { %v1384_v0 = vrot.slane %v645_v62, %v2074_v42  ;;  %433 = vadd.xlane.f32.xlu0 %v432_v52  ;;  %v269_v5 = vpop.xlane.xlu1 %268  ;;  %v144_v42 = vld [vmem:[%s2734_s0 + $0x3f0] sm:$0xff] }
  0xf9   :  { %v224_v6 = vpop.xlane.xlu0 %223  ;;  %v2435_v32 = vsel %vm854_vm9, %v853_v3, %v2348_v8  ;;  %v571_v13 = vmul.f32 0.0625, %v269_v5  ;;  %1647 = vmatpush3.bf16.msra.mxu0 %v1646_v4  ;;  %v1471_v8 = vld [vmem:[%s2735_s1 + $0x20] sm:$0xff]  ;;  %v525_v23 = vsel %vm146_vm0, %v144_v42, 0.0  ;;  %vm896_vm0 = vcmask 1048512  }
  0xfa   :  { %v2439_v12 = vsel %vm805_vm2, %v1384_v0, %v2351_v9  ;;  %v556_v16 = vmul.f32 0.0625, %v224_v6  ;;  %1648 = vmatprep.subr.bf16.mxu0 %v1719_v56  ;;  %v1472_v9 = vld [vmem:[%s2735_s1 + $0x28] sm:$0xff]  ;;  %v1658_v0 = vpack.c.bf16 %v1478_v46, %v1477_v57  ;;  %vm1453_vm2 = vcmask 1042434  }
  0xfb   :  { %v1019_v18 = vrot.slane %v571_v13, %v2329_v54  ;;  %481 = vadd.xlane.f32.xlu1 %v480_v11  ;;  %v1649_v21 = vpack.c.bf16 %v1472_v9, %v1471_v8  ;;  %v1479_v13 = vld [vmem:[%s2735_s1 + $0x60] sm:$0xff] }
  0xfc   :  { %v945_v19 = vrot.slane %v556_v16, %v2395_v48  ;;  %523 = vadd.xlane.f32.xlu0 %v522_v28  ;;  %v359_v22 = vpop.xlane.xlu1 %358 }
  0xfd   :  { %v314_v26 = vpop.xlane.xlu0 %313  ;;  %v1020_v33 = vsel %vm847_vm8, %v1019_v18, %v2364_v24  ;;  %v601_v31 = vmul.f32 0.0625, %v359_v22  ;;  %1650 = vmatpush3.bf16.msra.mxu0 %v1649_v21  ;;  %v863_v21 = vadd.s32 4294967208, %v2037_v17  ;;  %v1481_v22 = vld [vmem:[%s2735_s1 + $0x70] sm:$0xff] }
  0xfe   :  { %v946_v34 = vsel %vm854_vm9, %v945_v19, %v2368_v25  ;;  %v586_v14 = vmul.f32 0.0625, %v314_v26  ;;  %1651 = vmatprep.subr.bf16.mxu0 %v1719_v56  ;;  %v856_v25 = vadd.s32 4294967216, %v2037_v17  ;;  %v1482_v26 = vld [vmem:[%s2735_s1 + $0x78] sm:$0xff] }
  0xff   :  { %v1167_v39 = vrot.slane %v601_v31, %v2222_v2  ;;  %529 = vadd.xlane.f32.xlu1 %v528_v27 }
 0x100   :  { %v1093_v24 = vrot.slane %v586_v14, %v2273_v60  ;;  %526 = vadd.xlane.f32.xlu0 %v525_v23  ;;  %v449_v38 = vpop.xlane.xlu1 %448  ;;  %v2486_v51 = vsub.s32 %v856_v25, %v2045_v20 }
 0x101   :  { %v404_v43 = vpop.xlane.xlu0 %403  ;;  %v1168_v44 = vsel %vm833_vm6, %v1167_v39, %v2382_v40  ;;  %v631_v29 = vmul.f32 0.0625, %v449_v38  ;;  %1653 = vmatpush3.bf16.msra.mxu0 %v1652_v41  ;;  %v1721_v39 = vmov 0.0   ;;  %v2531_v41 = vsub.s32 %v863_v21, %v2045_v20 }
 0x102   :  { %v1094_v47 = vsel %vm840_vm7, %v1093_v24, %v2386_v37  ;;  %v616_v45 = vmul.f32 0.0625, %v404_v43  ;;  %1654 = vmatprep.subr.bf16.mxu0 %v1719_v56  ;;  %v1655_v37 = vpack.c.bf16 %v1476_v50, %v1475_v49  ;;  %1639 = vmatprep.mubr.msk.f32.mxu0 %vm1720_vm11, %v1721_v39 }
 0x103   :  { %v1315_v53 = vrot.slane %v631_v29, %v2131_v35 }
 0x104   :  { %v1241_v40 = vrot.slane %v616_v45, %v2170_v10  ;;  %v179_v55 = vpop.xlane.xlu1 %178 }
 0x105   :  { %v494_v52 = vpop.xlane.xlu0 %493  ;;  %v1316_v61 = vsel %vm819_vm4, %v1315_v53, %v2410_v59  ;;  %v541_v63 = vmul.f32 0.0625, %v179_v55  ;;  %1656 = vmatpush3.bf16.msra.mxu0 %v1655_v37 }
 0x106   :  { %v1242_v62 = vsel %vm826_vm5, %v1241_v40, %v2414_v58  ;;  %v646_v1 = vmul.f32 0.0625, %v494_v52  ;;  %1657 = vmatprep.subr.bf16.mxu0 %v1719_v56 }
 0x107   :  { %v860_v3 = vrot.slane %v541_v63, %v2486_v51 }
 0x108   :  { %v1389_v59 = vrot.slane %v646_v1, %v2105_v7  ;;  %v272_v58 = vpop.xlane.xlu1 %271  ;;  %v1480_v7 = vld [vmem:[%s2735_s1 + $0x68] sm:$0xff]  ;;  %s1722_s1 = smov [#allocation4]  }
 0x109   :  { %v227_v4 = vpop.xlane.xlu0 %226  ;;  %v862_v5 = vsel %vm861_vm10, %v860_v3, %v2435_v32  ;;  %v572_v11 = vmul.f32 0.0625, %v272_v58  ;;  %1659 = vmatpush3.bf16.msra.mxu0 %v1658_v0  ;;  %v1661_v42 = vpack.c.bf16 %v1480_v7, %v1479_v13  ;;  %s1577_s16 = sshll.u32 %s1722_s1, 4  ;;  %s1578_s16 = int_to_ptr.vmem [resolvable:$true] %s1577_s16 }
 0x10a   :  { %v1390_v6 = vsel %vm812_vm3, %v1389_v59, %v2439_v12  ;;  %v557_v28 = vmul.f32 0.0625, %v227_v4  ;;  %1660 = vmatprep.subr.bf16.mxu0 %v1719_v56  ;;  %v870_v4 = vadd.s32 4294967200, %v2037_v17  ;;  %vm1455_vm3 = vcmask 1043459   ;;  %s1671_s17 = scalar_lea.vmem %s1578_s16, 128  ;;  %p1676_p1 = scmp.lt.s32.totalorder %s1578_s16, %s1578_s16 }
 0x10b   :  { %v1024_v16 = vrot.slane %v572_v11, %v2395_v48  ;;  %p1672_p0 = scmp.ne.s32.totalorder %s1578_s16, %s1671_s17  ;;  %p1677_p2 = scmp.lt.s32.totalorder %s1671_s17, %s1671_s17 }
 0x10c   :  { %v950_v32 = vrot.slane %v557_v28, %v2486_v51  ;;  %v362_v15 = vpop.xlane.xlu1 %361 }
 0x10d   :  { %v317_v12 = vpop.xlane.xlu0 %316  ;;  %v1025_v8 = vsel %vm854_vm9, %v1024_v16, %v1020_v33  ;;  %v602_v18 = vmul.f32 0.0625, %v362_v15  ;;  %1662 = vmatpush3.bf16.msra.mxu0 %v1661_v42  ;;  %v1664_v33 = vpack.c.bf16 %v1482_v26, %v1481_v22  ;;  %v2551_v42 = vsub.s32 %v870_v4, %v2045_v20  ;;  %p1678_p3 = por %p1677_p2, %p1676_p1 }
 0x10e   :  { %v951_v9 = vsel %vm861_vm10, %v950_v32, %v946_v34  ;;  %v587_v19 = vmul.f32 0.0625, %v317_v12  ;;  %1663 = vmatprep.subr.bf16.mxu0 %v1719_v56 }
 0x10f   :  { %v1172_v23 = vrot.slane %v602_v18, %v2273_v60  ;;  %p1679_p4 = pnand %p1678_p3, %p1672_p0 }
 0x110   :  { %v1098_v27 = vrot.slane %v587_v19, %v2329_v54  ;;  %v452_v34 = vpop.xlane.xlu1 %451 }
 0x111   :  { %v407_v31 = vpop.xlane.xlu0 %406  ;;  %v1173_v14 = vsel %vm840_vm7, %v1172_v23, %v1168_v44  ;;  %v632_v56 = vmul.f32 0.0625, %v452_v34  ;;  %1665 = vmatpush3.bf16.msra.mxu0 %v1664_v33 }
 0x112   :  { %v1099_v30 = vsel %vm847_vm8, %v1098_v27, %v1094_v47  ;;  %v617_v36 = vmul.f32 0.0625, %v407_v31 }
 0x113   :  { %v1320_v24 = vrot.slane %v632_v56, %v2170_v10 }
 0x114   :  { %v1246_v25 = vrot.slane %v617_v36, %v2222_v2  ;;  %v182_v38 = vpop.xlane.xlu1 %181 }
 0x115   :  { %v497_v43 = vpop.xlane.xlu0 %496  ;;  %v1321_v29 = vsel %vm826_vm5, %v1320_v24, %v1316_v61  ;;  %v542_v47 = vmul.f32 0.0625, %v182_v38 }
 0x116   :  { %v1247_v44 = vsel %vm833_vm6, %v1246_v25, %v1242_v62  ;;  %v647_v45 = vmul.f32 0.0625, %v497_v43 }
 0x117   :  { %v867_v49 = vrot.slane %v542_v47, %v2531_v41 }
 0x118   :  { %v1394_v50 = vrot.slane %v647_v45, %v2131_v35  ;;  %v275_v53 = vpop.xlane.xlu1 %274 }
 0x119   :  { %v230_v40 = vpop.xlane.xlu0 %229  ;;  %v869_v37 = vsel %vm868_vm12, %v867_v49, %v862_v5  ;;  %v573_v52 = vmul.f32 0.0625, %v275_v53 }
 0x11a   :  { %v1395_v55 = vsel %vm819_vm4, %v1394_v50, %v1390_v6  ;;  %v558_v63 = vmul.f32 0.0625, %v230_v40  ;;  %vm1457_vm4 = vcmask 1044484  }
 0x11b   :  { %v1029_v1 = vrot.slane %v573_v52, %v2486_v51 }
 0x11c   :  { %v955_v61 = vrot.slane %v558_v63, %v2531_v41  ;;  %v365_v62 = vpop.xlane.xlu1 %364 }
 0x11d   :  { %v320_v57 = vpop.xlane.xlu0 %319  ;;  %v1030_v46 = vsel %vm861_vm10, %v1029_v1, %v1025_v8  ;;  %v603_v59 = vmul.f32 0.0625, %v365_v62 }
 0x11e   :  { %v956_v3 = vsel %vm868_vm12, %v955_v61, %v951_v9  ;;  %v588_v35 = vmul.f32 0.0625, %v320_v57 }
 0x11f   :  { %v1177_v0 = vrot.slane %v603_v59, %v2329_v54 }
 0x120   :  { %v1103_v58 = vrot.slane %v588_v35, %v2395_v48  ;;  %v455_v5 = vpop.xlane.xlu1 %454 }
 0x121   :  { %v410_v6 = vpop.xlane.xlu0 %409  ;;  %v1178_v11 = vsel %vm847_vm8, %v1177_v0, %v1173_v14  ;;  %v633_v13 = vmul.f32 0.0625, %v455_v5 }
 0x122   :  { %v1104_v28 = vsel %vm854_vm9, %v1103_v58, %v1099_v30  ;;  %v618_v7 = vmul.f32 0.0625, %v410_v6 }
 0x123   :  { %v1325_v16 = vrot.slane %v633_v13, %v2222_v2 }
 0x124   :  { %v1251_v32 = vrot.slane %v618_v7, %v2273_v60  ;;  %v185_v15 = vpop.xlane.xlu1 %184 }
 0x125   :  { %v500_v12 = vpop.xlane.xlu0 %499  ;;  %v1326_v8 = vsel %vm833_vm6, %v1325_v16, %v1321_v29  ;;  %v543_v18 = vmul.f32 0.0625, %v185_v15  ;;  %v877_v29 = vadd.s32 4294967192, %v2037_v17 }
 0x126   :  { %v1252_v9 = vsel %vm840_vm7, %v1251_v32, %v1247_v44  ;;  %v648_v19 = vmul.f32 0.0625, %v500_v12 }
 0x127   :  { %v874_v21 = vrot.slane %v543_v18, %v2551_v42 }
 0x128   :  { %v1399_v22 = vrot.slane %v648_v19, %v2170_v10  ;;  %v278_v26 = vpop.xlane.xlu1 %277 }
 0x129   :  { %v233_v23 = vpop.xlane.xlu0 %232  ;;  %v876_v27 = vsel %vm875_vm13, %v874_v21, %v869_v37  ;;  %v574_v34 = vmul.f32 0.0625, %v278_v26 }
 0x12a   :  { %v1400_v33 = vsel %vm826_vm5, %v1399_v22, %v1395_v55  ;;  %v559_v31 = vmul.f32 0.0625, %v233_v23  ;;  %v2571_v55 = vsub.s32 %v877_v29, %v2045_v20  ;;  %vm1459_vm5 = vcmask 1045509  }
 0x12b   :  { %v1034_v14 = vrot.slane %v574_v34, %v2531_v41 }
 0x12c   :  { %v960_v30 = vrot.slane %v559_v31, %v2551_v42  ;;  %v368_v56 = vpop.xlane.xlu1 %367 }
 0x12d   :  { %v323_v36 = vpop.xlane.xlu0 %322  ;;  %v1035_v39 = vsel %vm868_vm12, %v1034_v14, %v1030_v46  ;;  %v604_v25 = vmul.f32 0.0625, %v368_v56 }
 0x12e   :  { %v961_v24 = vsel %vm875_vm13, %v960_v30, %v956_v3  ;;  %v589_v10 = vmul.f32 0.0625, %v323_v36 }
 0x12f   :  { %v1182_v38 = vrot.slane %v604_v25, %v2395_v48 }
 0x130   :  { %v1108_v43 = vrot.slane %v589_v10, %v2486_v51  ;;  %v458_v44 = vpop.xlane.xlu1 %457 }
 0x131   :  { %v413_v47 = vpop.xlane.xlu0 %412  ;;  %v1183_v45 = vsel %vm854_vm9, %v1182_v38, %v1178_v11  ;;  %v634_v50 = vmul.f32 0.0625, %v458_v44 }
 0x132   :  { %v1109_v49 = vsel %vm861_vm10, %v1108_v43, %v1104_v28  ;;  %v619_v53 = vmul.f32 0.0625, %v413_v47 }
 0x133   :  { %v1330_v40 = vrot.slane %v634_v50, %v2273_v60 }
 0x134   :  { %v1256_v37 = vrot.slane %v619_v53, %v2329_v54  ;;  %v188_v52 = vpop.xlane.xlu1 %187 }
 0x135   :  { %v503_v63 = vpop.xlane.xlu0 %502  ;;  %v1331_v1 = vsel %vm840_vm7, %v1330_v40, %v1326_v8  ;;  %v544_v62 = vmul.f32 0.0625, %v188_v52  ;;  %v884_v8 = vadd.s32 4294967184, %v2037_v17 }
 0x136   :  { %v1257_v61 = vsel %vm847_vm8, %v1256_v37, %v1252_v9  ;;  %v649_v57 = vmul.f32 0.0625, %v503_v63 }
 0x137   :  { %v881_v46 = vrot.slane %v544_v62, %v2571_v55 }
 0x138   :  { %v1404_v3 = vrot.slane %v649_v57, %v2222_v2  ;;  %v281_v59 = vpop.xlane.xlu1 %280 }
 0x139   :  { %v236_v35 = vpop.xlane.xlu0 %235  ;;  %v883_v0 = vsel %vm882_vm14, %v881_v46, %v876_v27  ;;  %v575_v4 = vmul.f32 0.0625, %v281_v59 }
 0x13a   :  { %v1405_v58 = vsel %vm833_vm6, %v1404_v3, %v1400_v33  ;;  %v560_v5 = vmul.f32 0.0625, %v236_v35  ;;  %v2597_v33 = vsub.s32 %v884_v8, %v2045_v20  ;;  %vm1461_vm6 = vcmask 1046534  }
 0x13b   :  { %v1039_v6 = vrot.slane %v575_v4, %v2551_v42 }
 0x13c   :  { %v965_v11 = vrot.slane %v560_v5, %v2571_v55  ;;  %v371_v28 = vpop.xlane.xlu1 %370 }
 0x13d   :  { %v326_v13 = vpop.xlane.xlu0 %325  ;;  %v2582_v7 = vsel %vm875_vm13, %v1039_v6, %v1035_v39  ;;  %v605_v2 = vmul.f32 0.0625, %v371_v28 }
 0x13e   :  { %v966_v16 = vsel %vm882_vm14, %v965_v11, %v961_v24  ;;  %v590_v32 = vmul.f32 0.0625, %v326_v13 }
 0x13f   :  { %v1187_v15 = vrot.slane %v605_v2, %v2486_v51 }
 0x140   :  { %v1113_v12 = vrot.slane %v590_v32, %v2531_v41  ;;  %v461_v9 = vpop.xlane.xlu1 %460 }
 0x141   :  { %v416_v18 = vpop.xlane.xlu0 %415  ;;  %v2589_v19 = vsel %vm861_vm10, %v1187_v15, %v1183_v45  ;;  %v635_v22 = vmul.f32 0.0625, %v461_v9 }
 0x142   :  { %v2592_v21 = vsel %vm868_vm12, %v1113_v12, %v1109_v49  ;;  %v620_v26 = vmul.f32 0.0625, %v416_v18  ;;  %v891_v49 = vadd.s32 4294967176, %v2037_v17 }
 0x143   :  { %v1335_v23 = vrot.slane %v635_v22, %v2329_v54 }
 0x144   :  { %v1261_v27 = vrot.slane %v620_v26, %v2395_v48  ;;  %v191_v34 = vpop.xlane.xlu1 %190 }
 0x145   :  { %v506_v31 = vpop.xlane.xlu0 %505  ;;  %v2600_v14 = vsel %vm847_vm8, %v1335_v23, %v1331_v1  ;;  %v545_v56 = vmul.f32 0.0625, %v191_v34 }
 0x146   :  { %v2603_v30 = vsel %vm854_vm9, %v1261_v27, %v1257_v61  ;;  %v650_v36 = vmul.f32 0.0625, %v506_v31 }
 0x147   :  { %v888_v39 = vrot.slane %v545_v56, %v2597_v33 }
 0x148   :  { %v1409_v24 = vrot.slane %v650_v36, %v2273_v60  ;;  %v284_v25 = vpop.xlane.xlu1 %283  ;;  %v2619_v60 = vsub.s32 %v891_v49, %v2045_v20 }
 0x149   :  { %v239_v10 = vpop.xlane.xlu0 %238  ;;  %v890_v38 = vsel %vm889_vm15, %v888_v39, %v883_v0  ;;  %v576_v0 = vmul.f32 0.0625, %v284_v25 }
 0x14a   :  { %v2609_v43 = vsel %vm840_vm7, %v1409_v24, %v1405_v58  ;;  %v561_v50 = vmul.f32 0.0625, %v239_v10  ;;  %vm1463_vm7 = vcmask 1047559  }
 0x14b   :  { %v1044_v6 = vrot.slane %v576_v0, %v2571_v55 }
 0x14c   :  { %v374_v29 = vpop.xlane.xlu1 %373  ;;  %v970_v52 = vrot.slane %v561_v50, %v2597_v33 }
 0x14d   :  { %v329_v44 = vpop.xlane.xlu0 %328 }
 0x14e   :  { %v971_v17 = vsel %vm889_vm15, %v970_v52, %v966_v16  ;;  %v1045_v16 = vsel %vm882_vm14, %v1044_v6, %v2582_v7  ;;  %v591_v18 = vmul.f32 0.0625, %v329_v44 }
 0x150   :  { %v2611_v47 = vpop.xlane.xlu1 %463  ;;  %v1118_v31 = vrot.slane %v591_v18, %v2551_v42 }
 0x151   :  { %v2613_v45 = vpop.xlane.xlu0 %418 }
 0x152   :  { %v1119_v25 = vsel %vm875_vm13, %v1118_v31, %v2592_v21 }
 0x154   :  { %v194_v53 = vpop.xlane.xlu1 %193 }
 0x155   :  { %v2616_v40 = vpop.xlane.xlu0 %508  ;;  %v546_v37 = vmul.f32 0.0625, %v194_v53  ;;  %v606_v53 = vmul.f32 0.0625, %v374_v29 }
 0x157   :  { %v895_v61 = vrot.slane %v546_v37, %v2619_v60  ;;  %v1192_v21 = vrot.slane %v606_v53, %v2531_v41 }
 0x158   :  { %v287_v63 = vpop.xlane.xlu1 %286 }
 0x159   :  { %v242_v1 = vpop.xlane.xlu0 %241  ;;  %v897_v59 = vsel %vm896_vm0, %v895_v61, %v890_v38  ;;  %v577_v58 = vmul.f32 0.0625, %v287_v63 }
 0x15a   :  { %v562_v62 = vmul.f32 0.0625, %v242_v1 }
 0x15b   :  { %v1049_v11 = vrot.slane %v577_v58, %v2597_v33 }
 0x15c   :  { %v975_v57 = vrot.slane %v562_v62, %v2619_v60  ;;  %v377_v46 = vpop.xlane.xlu1 %376 }
 0x15d   :  { %v332_v3 = vpop.xlane.xlu0 %331  ;;  %v1050_v15 = vsel %vm889_vm15, %v1049_v11, %v1045_v16  ;;  %v607_v52 = vmul.f32 0.0625, %v377_v46  ;;  %v1193_v46 = vsel %vm868_vm12, %v1192_v21, %v2589_v19 }
 0x15e   :  { %v976_v20 = vsel %vm896_vm0, %v975_v57, %v971_v17  ;;  %v592_v26 = vmul.f32 0.0625, %v332_v3  ;;  %v636_v17 = vmul.f32 0.0625, %v2611_v47 }
 0x15f   :  { %v1452_v35 = vsel %vm1451_vm1, %v976_v20, %v897_v59  ;;  %v1197_v3 = vrot.slane %v607_v52, %v2551_v42  ;;  %v621_v59 = vmul.f32 0.0625, %v2613_v45 }
 0x160   :  { %v467_v4 = vpop.xlane.xlu1 %466  ;;  %v1123_v56 = vrot.slane %v592_v26, %v2571_v55  ;;  %v1340_v11 = vrot.slane %v636_v17, %v2395_v48 }
 0x161   :  { %v422_v5 = vpop.xlane.xlu0 %421  ;;  %v1198_v47 = vsel %vm875_vm13, %v1197_v3, %v1193_v46  ;;  %v1266_v45 = vrot.slane %v621_v59, %v2486_v51 }
 0x162   :  { %v1124_v10 = vsel %vm882_vm14, %v1123_v56, %v1119_v25  ;;  %v622_v58 = vmul.f32 0.0625, %v422_v5 }
 0x164   :  { %v290_v28 = vpop.xlane.xlu1 %289 }
 0x165   :  { %v2629_v13 = vpop.xlane.xlu0 %511  ;;  %v578_v2 = vmul.f32 0.0625, %v290_v28  ;;  %v637_v28 = vmul.f32 0.0625, %v467_v4 }
 0x167   :  { %v1054_v32 = vrot.slane %v578_v2, %v2619_v60  ;;  %v1345_v26 = vrot.slane %v637_v28, %v2486_v51 }
 0x168   :  { %v380_v12 = vpop.xlane.xlu1 %379 }
 0x169   :  { %v335_v8 = vpop.xlane.xlu0 %334  ;;  %v1055_v9 = vsel %vm896_vm0, %v1054_v32, %v1050_v15  ;;  %v608_v1 = vmul.f32 0.0625, %v380_v12  ;;  %v651_v12 = vmul.f32 0.0625, %v2616_v40  ;;  %v1341_v40 = vsel %vm854_vm9, %v1340_v11, %v2600_v14 }
 0x16a   :  { %v1454_v22 = vsel %vm1453_vm2, %v1055_v9, %v1452_v35  ;;  %v593_v23 = vmul.f32 0.0625, %v335_v8 }
 0x16b   :  { %v1202_v20 = vrot.slane %v608_v1, %v2571_v55 }
 0x16c   :  { %v470_v27 = vpop.xlane.xlu1 %469  ;;  %v1128_v7 = vrot.slane %v593_v23, %v2597_v33 }
 0x16d   :  { %v425_v34 = vpop.xlane.xlu0 %424  ;;  %v1203_v16 = vsel %vm882_vm14, %v1202_v20, %v1198_v47  ;;  %v638_v8 = vmul.f32 0.0625, %v470_v27  ;;  %v1267_v27 = vsel %vm861_vm10, %v1266_v45, %v2603_v30  ;;  %v1346_v30 = vsel %vm861_vm10, %v1345_v26, %v1341_v40 }
 0x16e   :  { %v1129_v44 = vsel %vm889_vm15, %v1128_v7, %v1124_v10  ;;  %v623_v2 = vmul.f32 0.0625, %v425_v34 }
 0x16f   :  { %v1350_v25 = vrot.slane %v638_v8, %v2531_v41 }
 0x170   :  { %v338_v36 = vpop.xlane.xlu1 %337  ;;  %v1276_v23 = vrot.slane %v623_v2, %v2551_v42 }
 0x171   :  { %v515_v39 = vpop.xlane.xlu0 %514  ;;  %v594_v24 = vmul.f32 0.0625, %v338_v36  ;;  %v1414_v36 = vrot.slane %v651_v12, %v2329_v54 }
 0x173   :  { %v1133_v38 = vrot.slane %v594_v24, %v2619_v60  ;;  %v652_v24 = vmul.f32 0.0625, %v2629_v13 }
 0x174   :  { %v428_v49 = vpop.xlane.xlu1 %427 }
 0x175   :  { %v383_v50 = vpop.xlane.xlu0 %382  ;;  %v1134_v37 = vsel %vm896_vm0, %v1133_v38, %v1129_v44  ;;  %v624_v32 = vmul.f32 0.0625, %v428_v49 }
 0x176   :  { %v1456_v63 = vsel %vm1455_vm3, %v1134_v37, %v1454_v22  ;;  %v609_v61 = vmul.f32 0.0625, %v383_v50  ;;  %v1271_v22 = vrot.slane %v622_v58, %v2531_v41  ;;  %v653_v50 = vmul.f32 0.0625, %v515_v39 }
 0x177   :  { %v1281_v56 = vrot.slane %v624_v32, %v2571_v55  ;;  %v1351_v39 = vsel %vm868_vm12, %v1350_v25, %v1346_v30  ;;  %v1415_v58 = vsel %vm847_vm8, %v1414_v36, %v2609_v43 }
 0x178   :  { %v518_v62 = vpop.xlane.xlu1 %517  ;;  %v1207_v29 = vrot.slane %v609_v61, %v2597_v33  ;;  %v1272_v49 = vsel %vm868_vm12, %v1271_v22, %v1267_v27 }
 0x179   :  { %v473_v57 = vpop.xlane.xlu0 %472  ;;  %v1277_v37 = vsel %vm875_vm13, %v1276_v23, %v1272_v49  ;;  %v654_v52 = vmul.f32 0.0625, %v518_v62  ;;  %v1424_v62 = vrot.slane %v653_v50, %v2486_v51 }
 0x17a   :  { %v1208_v19 = vsel %vm889_vm15, %v1207_v29, %v1203_v16  ;;  %v639_v34 = vmul.f32 0.0625, %v473_v57  ;;  %v1282_v13 = vsel %vm882_vm14, %v1281_v56, %v1277_v37  ;;  %v1419_v57 = vrot.slane %v652_v24, %v2395_v48 }
 0x17c   :  { %v431_v35 = vpop.xlane.xlu1 %430  ;;  %v1355_v54 = vrot.slane %v639_v34, %v2551_v42  ;;  %v1420_v47 = vsel %vm854_vm9, %v1419_v57, %v1415_v58 }
 0x17d   :  { %v386_v0 = vpop.xlane.xlu0 %385  ;;  %v625_v5 = vmul.f32 0.0625, %v431_v35  ;;  %v1425_v16 = vsel %vm861_vm10, %v1424_v62, %v1420_v47 }
 0x17e   :  { %v610_v6 = vmul.f32 0.0625, %v386_v0  ;;  %v1429_v0 = vrot.slane %v654_v52, %v2531_v41  ;;  %v1356_v46 = vsel %vm875_vm13, %v1355_v54, %v1351_v39 }
 0x17f   :  { %v1286_v10 = vrot.slane %v625_v5, %v2597_v33 }
 0x180   :  { %v1212_v15 = vrot.slane %v610_v6, %v2619_v60  ;;  %v521_v9 = vpop.xlane.xlu1 %520 }
 0x181   :  { %v476_v18 = vpop.xlane.xlu0 %475  ;;  %v1287_v21 = vsel %vm889_vm15, %v1286_v10, %v1282_v13 }
 0x182   :  { %v1213_v4 = vsel %vm896_vm0, %v1212_v15, %v1208_v19  ;;  %v640_v7 = vmul.f32 0.0625, %v476_v18 }
 0x183   :  { %v1458_v31 = vsel %vm1457_vm4, %v1213_v4, %v1456_v63  ;;  %v655_v63 = vmul.f32 0.0625, %v521_v9 }
 0x184   :  { %v479_v38 = vpop.xlane.xlu1 %478  ;;  %v1360_v1 = vrot.slane %v640_v7, %v2571_v55 }
 0x185   :  { %v434_v44 = vpop.xlane.xlu0 %433  ;;  %v641_v14 = vmul.f32 0.0625, %v479_v38  ;;  %v1434_v6 = vrot.slane %v655_v63, %v2551_v42  ;;  %v1430_v42 = vsel %vm868_vm12, %v1429_v0, %v1425_v16 }
 0x186   :  { %v626_v53 = vmul.f32 0.0625, %v434_v44  ;;  %v1361_v11 = vsel %vm882_vm14, %v1360_v1, %v1356_v46 }
 0x187   :  { %v1365_v17 = vrot.slane %v641_v14, %v2597_v33  ;;  %v1435_v8 = vsel %vm875_vm13, %v1434_v6, %v1430_v42 }
 0x188   :  { %v1291_v61 = vrot.slane %v626_v53, %v2619_v60  ;;  %v482_v3 = vpop.xlane.xlu1 %481 }
 0x189   :  { %v524_v59 = vpop.xlane.xlu0 %523  ;;  %v642_v29 = vmul.f32 0.0625, %v482_v3  ;;  %v1366_v28 = vsel %vm889_vm15, %v1365_v17, %v1361_v11 }
 0x18a   :  { %v1292_v20 = vsel %vm896_vm0, %v1291_v61, %v1287_v21  ;;  %v656_v35 = vmul.f32 0.0625, %v524_v59 }
 0x18b   :  { %v1460_v48 = vsel %vm1459_vm5, %v1292_v20, %v1458_v31  ;;  %v1370_v51 = vrot.slane %v642_v29, %v2619_v60 }
 0x18c   :  { %v1439_v41 = vrot.slane %v656_v35, %v2571_v55  ;;  %v530_v45 = vpop.xlane.xlu1 %529 }
 0x18d   :  { %v527_v2 = vpop.xlane.xlu0 %526  ;;  %v658_v15 = vmul.f32 0.0625, %v530_v45  ;;  %v1371_v43 = vsel %vm896_vm0, %v1370_v51, %v1366_v28 }
 0x18e   :  { %v657_v32 = vmul.f32 0.0625, %v527_v2  ;;  %v1462_v12 = vsel %vm1461_vm6, %v1371_v43, %v1460_v48  ;;  %v1440_v9 = vsel %vm882_vm14, %v1439_v41, %v1435_v8 }
 0x18f   :  { %v1449_v5 = vrot.slane %v658_v15, %v2619_v60 }
 0x190   :  { %v1444_v19 = vrot.slane %v657_v32, %v2597_v33 }
 0x192   :  { %v1445_v55 = vsel %vm889_vm15, %v1444_v19, %v1440_v9 }
 0x193   :  { %v1450_v18 = vsel %vm896_vm0, %v1449_v5, %v1445_v55 }
 0x194   :  { %v1464_v22 = vsel %vm1463_vm7, %v1450_v18, %v1462_v12 }
 0x195   :  { %1640 = vmatmul.mubr.f32.vlgmr.msra.gmra.mrb[0].mxu0 %v1464_v22  ;;  %1466 = vst [vmem:[#allocation4] sm:$0xff] %v1464_v22 }
 0x196   :  { %1682 = shalt.err (!%p1679_p4)
}
 0x197   :  { %s1683_s20 = scalar_lea.hbm %s2738_s4, 128 }
 0x198   :  { %p1684_p5 = scmp.ne.s32.totalorder %s2738_s4, %s1683_s20  ;;  %p1687_p6 = scmp.lt.u32.totalorder %s1683_s20, %s2738_s4 }
 0x19a   :  { %p1689_p7 = pnand %p1687_p6, %p1684_p5 }
 0x19c   :  { %1692 = shalt.err (!%p1689_p7)
}
 0x19d   :  { %1580 = dma.vmem_to_hbm [thread:$0]  %s1578_s16, 128, %s2738_s4, [#allocation5]   ;;  %v1589_v33 = vld [vmem:[%s2736_s2] ss:$0 sm:$0xff] }
 0x19e   :  { %s1723_s28 = smov [#allocation2]  }
 0x19f   :  { %s1567_s29 = sshll.u32 %s1723_s28, 4  ;;  %s1568_s29 = int_to_ptr.vmem [resolvable:$true] %s1567_s29 }
 0x1a0   :  { %s1693_s30 = scalar_lea.vmem %s1568_s29, 128  ;;  %p1698_p9 = scmp.lt.s32.totalorder %s1568_s29, %s1568_s29 }
 0x1a1   :  { %p1694_p8 = scmp.ne.s32.totalorder %s1568_s29, %s1693_s30  ;;  %p1699_p10 = scmp.lt.s32.totalorder %s1693_s30, %s1693_s30 }
 0x1a3   :  { %p1700_p11 = por %p1699_p10, %p1698_p9 }
 0x1a5   :  { %p1701_p12 = pnand %p1700_p11, %p1694_p8 }
 0x268   :  { %v1556_v60 = vpop.f32.mrb[0].mxu0 }
 0x269   :  { %v1557_v4 = vadd.f32 %v1589_v33, %v1556_v60  ;;  %v1641_v26 = vpop.f32.mrb[1].mxu0 }
 0x26b   :  { %1560 = vst [vmem:[#allocation2] sm:$0xff] %v1557_v4 }
 0x26c   :  { %1704 = shalt.err (!%p1701_p12)
}
 0x26d   :  { %s1705_s6 = scalar_lea.hbm %s2737_s3, 128 }
 0x26e   :  { %p1706_p13 = scmp.ne.s32.totalorder %s2737_s3, %s1705_s6  ;;  %p1709_p0 = scmp.lt.u32.totalorder %s1705_s6, %s2737_s3 }
 0x270   :  { %p1711_p1 = pnand %p1709_p0, %p1706_p13 }
 0x272   :  { %1714 = shalt.err (!%p1711_p1)
}
 0x273   :  { %1570 = dma.vmem_to_hbm [thread:$0]  %s1568_s29, 128, %s2737_s3, [#allocation3]  }
 0x274   :  { %1715 = dma.done.wait [#allocation3], 128  }
 0x275   :  { %1716 = vsyncadd [#allocation3], 4294967168 }
 0x276   :  { %1717 = dma.done.wait [#allocation5], 128  }
 0x277   :  { %1718 = vsyncadd [#allocation5], 4294967168 }
 0x278   :  { %1587 = vsyncpa [#allocation3], 1 }
 0x279   :  { %1588 = vsyncpa [#allocation5], 1 }

</bundles_post_ra>
